<compile_context>
chip_gen: v6e
topology: v6e:2x2x1
jax: 0.10.0
libtpu: 0.0.40
codegen_flags: <defaults>
</compile_context>

<pallas_src>
import functools

import jax
import jax.numpy as jnp
from jax import lax
from jax.experimental import pallas as pl
from jax.experimental.pallas import tpu as pltpu

POOL_SIZES = (5, 9, 13)
_PAD = 6  # max(k // 2 for k in POOL_SIZES)


# --------------------------------------------------------------------------- #
# helpers
# --------------------------------------------------------------------------- #
def _pad_value(dtype):
    """Identity element for max in this dtype."""
    if jnp.issubdtype(dtype, jnp.floating):
        return jnp.array(-jnp.inf, dtype)
    if dtype == jnp.bool_:
        return jnp.array(False, dtype)
    return jnp.array(jnp.iinfo(dtype).min, dtype)


def _round_up(x, m):
    return (x + m - 1) // m * m


def _vmem_bytes(shape, dtype):
    """VMEM footprint with TPU (sublane, lane) tiling/padding on the minor 2 dims."""
    itemsize = jnp.dtype(dtype).itemsize
    sublane = max(8, 32 // max(1, itemsize))  # 8 (f32), 16 (bf16/f16), 32 (i8)
    *lead, h, w = shape
    n = 1
    for d in lead:
        n *= int(d)
    return n * _round_up(int(h), sublane) * _round_up(int(w), 128) * itemsize


def _divisors_desc(n):
    return [d for d in range(n, 0, -1) if n % d == 0]


@functools.lru_cache(maxsize=None)
def _vmem_budget_and_limit():
    """Generation-aware (working-set budget, vmem_limit_bytes)."""
    cap = None
    try:
        cap = int(pltpu.get_tpu_info().vmem_capacity_bytes)
    except Exception:
        cap = None
    if cap is not None and cap >= 96 * 1024 * 1024:      # v5e / v6e: 128 MiB VMEM
        return 48 * 1024 * 1024, 96 * 1024 * 1024
    return 20 * 1024 * 1024, 48 * 1024 * 1024            # v7x (64 MiB) / unknown


# --------------------------------------------------------------------------- #
# shared kernel math (layout-generic: h/w axis positions are passed in)
# --------------------------------------------------------------------------- #
def _fill_pad_and_pool(x, xp_ref, cm_ref, p5_ref, p9_ref, h_ax, w_ax):
    """Fill the -inf padded scratch (border strips + interior) and compute the
    5x5 / 9x9 / 13x13 stride-1 max pools hierarchically.

    Returns (pool5_center, pool9_center, pool13) each shaped like x.
    All refs are 4-D; h_ax/w_ax give the spatial axes inside the block.
    """
    H = x.shape[h_ax]
    W = x.shape[w_ax]
    P = _PAD
    neg = _pad_value(x.dtype)

    def sl(h0, hs, w0, ws):
        idx = [slice(None)] * 4
        idx[h_ax] = slice(h0, h0 + hs)
        idx[w_ax] = slice(w0, w0 + ws)
        return tuple(idx)

    def strip(hs, ws):
        shp = list(xp_ref.shape)
        shp[h_ax] = hs
        shp[w_ax] = ws
        return jnp.full(tuple(shp), neg, xp_ref.dtype)

    # --- padded copy of x: write only the four border strips + the interior ---
    xp_ref[sl(0, P, 0, W + 2 * P)] = strip(P, W + 2 * P)          # top
    xp_ref[sl(H + P, P, 0, W + 2 * P)] = strip(P, W + 2 * P)      # bottom
    xp_ref[sl(P, H, 0, P)] = strip(H, P)                          # left
    xp_ref[sl(P, H, W + P, P)] = strip(H, P)                      # right
    xp_ref[sl(P, H, P, W)] = x                                    # interior

    # --- pool5: separable 5x5 running max over the extended [-4, H+4) region ---
    cm = xp_ref[sl(0, H + 12, 0, W + 8)]
    for dj in range(1, 5):
        cm = jnp.maximum(cm, xp_ref[sl(0, H + 12, dj, W + 8)])
    cm_ref[...] = cm                                              # column max (W pass)

    p5 = cm_ref[sl(0, H + 8, 0, W + 8)]
    for di in range(1, 5):
        p5 = jnp.maximum(p5, cm_ref[sl(di, H + 8, 0, W + 8)])
    p5_ref[...] = p5                                              # pool5 on [-4, H+4)

    # --- pool9 = max of four (+-2,+-2)-shifted pool5 (on [-2, H+2)) ------------
    p9_ref[...] = jnp.maximum(
        jnp.maximum(p5_ref[sl(0, H + 4, 0, W + 4)],
                    p5_ref[sl(0, H + 4, 4, W + 4)]),
        jnp.maximum(p5_ref[sl(4, H + 4, 0, W + 4)],
                    p5_ref[sl(4, H + 4, 4, W + 4)]))

    # --- pool13 = max of four (+-2,+-2)-shifted pool9 -------------------------
    p13 = jnp.maximum(
        jnp.maximum(p9_ref[sl(0, H, 0, W)], p9_ref[sl(0, H, 4, W)]),
        jnp.maximum(p9_ref[sl(4, H, 0, W)], p9_ref[sl(4, H, 4, W)]))

    p5_c = p5_ref[sl(4, H, 4, W)]
    p9_c = p9_ref[sl(2, H, 2, W)]
    return p5_c, p9_c, p13


# --------------------------------------------------------------------------- #
# NCHW-native kernel (module interface; zero layout transposes)
# --------------------------------------------------------------------------- #
def _spp_kernel_nchw(x_ref, o_ref, xp_ref, cm_ref, p5_ref, p9_ref):
    # x_ref : (nb, tc, H, W)                input block (W on lanes)
    # o_ref : (nb, 4, tc, H, W)             [identity, pool5, pool9, pool13]
    # xp_ref: (nb, tc, H+12, W+12)          -inf padded copy of the block
    # cm_ref: (nb, tc, H+12, W+8)           pool5 column-running-max
    # p5_ref: (nb, tc, H+8,  W+8)           pool5 on extended positions [-4, H+4)
    # p9_ref: (nb, tc, H+4,  W+4)           pool9 on extended positions [-2, H+2)
    x = x_ref[...]
    p5c, p9c, p13 = _fill_pad_and_pool(x, xp_ref, cm_ref, p5_ref, p9_ref,
                                       h_ax=2, w_ax=3)
    o_ref[:, 0, :, :, :] = x
    o_ref[:, 1, :, :, :] = p5c
    o_ref[:, 2, :, :, :] = p9c
    o_ref[:, 3, :, :, :] = p13


def _nchw_working_set(nb, tc, H, W, dtype):
    shapes = [
        (2, nb, tc, H, W),                  # input block (double buffered)
        (2, nb, 4, tc, H, W),               # output block (double buffered)
        (nb, tc, H + 12, W + 12),           # padded scratch
        (nb, tc, H + 12, W + 8),            # pool5 column-max scratch
        (nb, tc, H + 8, W + 8),             # pool5 scratch
        (nb, tc, H + 4, W + 4),             # pool9 scratch
        (2, nb, tc, H + 8, W + 8),          # slack: fused-expression temporaries
    ]
    return sum(_vmem_bytes(s, dtype) for s in shapes)


def _choose_nchw_tiles(N, C, H, W, dtype, budget):
    tc = next((d for d in _divisors_desc(C)
               if _nchw_working_set(1, d, H, W, dtype) <= budget), 1)
    nb = next((d for d in _divisors_desc(N)
               if _nchw_working_set(d, tc, H, W, dtype) <= budget), 1)
    return nb, tc


@jax.jit
def spatial_pyramid_pooling(x):
    """NCHW interface matching the PyTorch module: (N, C, H, W) -> (N, 4C, H, W).

    Computed natively in NCHW (no layout transposes); the final reshape merges
    adjacent major dims (4, C) -> 4C and is free.
    """
    N, C, H, W = x.shape
    budget, limit = _vmem_budget_and_limit()
    nb, tc = _choose_nchw_tiles(N, C, H, W, x.dtype, budget)
    grid = (N // nb, C // tc)

    out5 = pl.pallas_call(
        _spp_kernel_nchw,
        out_shape=jax.ShapeDtypeStruct((N, 4, C, H, W), x.dtype),
        grid_spec=pltpu.PrefetchScalarGridSpec(
            num_scalar_prefetch=0,
            grid=grid,
            in_specs=[pl.BlockSpec((nb, tc, H, W), lambda n, c: (n, c, 0, 0))],
            out_specs=pl.BlockSpec((nb, 4, tc, H, W),
                                   lambda n, c: (n, 0, c, 0, 0)),
            scratch_shapes=[
                pltpu.VMEM((nb, tc, H + 12, W + 12), x.dtype),
                pltpu.VMEM((nb, tc, H + 12, W + 8), x.dtype),
                pltpu.VMEM((nb, tc, H + 8, W + 8), x.dtype),
                pltpu.VMEM((nb, tc, H + 4, W + 4), x.dtype),
            ]),
        compiler_params=pltpu.CompilerParams(
            dimension_semantics=("parallel", "parallel"),
            vmem_limit_bytes=limit),
    )(x)
    return out5.reshape(N, 4 * C, H, W)


# --------------------------------------------------------------------------- #
# NHWC (channel-on-lane) kernel for NHWC pipelines: (N, H, W, C) -> (N, H, W, 4C)
# --------------------------------------------------------------------------- #
def _spp_kernel_nhwc(x_ref, o_ref, xp_ref, cm_ref, p5_ref, p9_ref):
    # x_ref : (nb, H, W, C)       full-channel block, channels on lanes
    # o_ref : (nb, H, W, 4C)      channel-concat [x, pool5, pool9, pool13]
    C = x_ref.shape[-1]
    x = x_ref[...]
    p5c, p9c, p13 = _fill_pad_and_pool(x, xp_ref, cm_ref, p5_ref, p9_ref,
                                       h_ax=1, w_ax=2)
    o_ref[:, :, :, 0:C] = x
    o_ref[:, :, :, C:2 * C] = p5c
    o_ref[:, :, :, 2 * C:3 * C] = p9c
    o_ref[:, :, :, 3 * C:4 * C] = p13


def _nhwc_working_set(nb, C, H, W, dtype):
    shapes = [
        (2, nb, H, W, C),                   # input block (double buffered)
        (2, nb, H, W, 4 * C),               # output block (double buffered)
        (nb, H + 12, W + 12, C),            # padded scratch
        (nb, H + 12, W + 8, C),             # pool5 column-max scratch
        (nb, H + 8, W + 8, C),              # pool5 scratch
        (nb, H + 4, W + 4, C),              # pool9 scratch
        (2, nb, H + 8, W + 8, C),           # slack: fused-expression temporaries
    ]
    return sum(_vmem_bytes(s, dtype) for s in shapes)


@jax.jit
def spatial_pyramid_pooling_nhwc(x):
    """Lane-dense NHWC entry point: (N, H, W, C) -> (N, H, W, 4C), no transposes."""
    N, H, W, C = x.shape
    budget, limit = _vmem_budget_and_limit()
    nb = next((d for d in _divisors_desc(N)
               if _nhwc_working_set(d, C, H, W, x.dtype) <= budget), None)
    if nb is None:
        # TODO(synk): channel-tiled NHWC output needs a non-rectangular block; use
        # the NCHW-native path for such (unusually large) shapes instead.
        raise ValueError("NHWC SPP fast path requires the full channel block to "
                         f"fit VMEM (C={C}, H={H}, W={W}); use "
                         "spatial_pyramid_pooling (NCHW) instead.")
    grid = (N // nb,)

    return pl.pallas_call(
        _spp_kernel_nhwc,
        out_shape=jax.ShapeDtypeStruct((N, H, W, 4 * C), x.dtype),
        grid_spec=pltpu.PrefetchScalarGridSpec(
            num_scalar_prefetch=0,
            grid=grid,
            in_specs=[pl.BlockSpec((nb, H, W, C), lambda n: (n, 0, 0, 0))],
            out_specs=pl.BlockSpec((nb, H, W, 4 * C), lambda n: (n, 0, 0, 0)),
            scratch_shapes=[
                pltpu.VMEM((nb, H + 12, W + 12, C), x.dtype),
                pltpu.VMEM((nb, H + 12, W + 8, C), x.dtype),
                pltpu.VMEM((nb, H + 8, W + 8, C), x.dtype),
                pltpu.VMEM((nb, H + 4, W + 4, C), x.dtype),
            ]),
        compiler_params=pltpu.CompilerParams(
            dimension_semantics=("parallel",),
            vmem_limit_bytes=limit),
    )(x)


# --------------------------------------------------------------------------- #
# pure-JAX reference (validation only)
# --------------------------------------------------------------------------- #
def _reference_spp(x):
    if jnp.issubdtype(x.dtype, jnp.floating):
        init = jnp.array(-jnp.inf, x.dtype)
    else:
        init = jnp.array(jnp.iinfo(x.dtype).min, x.dtype)
    feats = [x]
    for k in POOL_SIZES:
        p = k // 2
        feats.append(
            lax.reduce_window(
                x, init, lax.max,
                window_dimensions=(1, 1, k, k),
                window_strides=(1, 1, 1, 1),
                padding=[(0, 0), (0, 0), (p, p), (p, p)]))
    return jnp.concatenate(feats, axis=1)


if __name__ == "__main__":
    key = jax.random.PRNGKey(0)
    x = jax.random.normal(key, (2, 4, 16, 16), dtype=jnp.float32)

    # NCHW module-equivalent path.
    out = jax.block_until_ready(spatial_pyramid_pooling(x))
    ref = _reference_spp(x)
    assert out.shape == (2, 16, 16, 16), out.shape
    assert jnp.allclose(out, ref, atol=1e-6, rtol=1e-6), "NCHW kernel mismatch"

    # NHWC (lane-dense) path.
    x_nhwc = jnp.transpose(x, (0, 2, 3, 1))
    out_nhwc = jax.block_until_ready(spatial_pyramid_pooling_nhwc(x_nhwc))
    ref_nhwc = jnp.transpose(ref, (0, 2, 3, 1))
    assert out_nhwc.shape == (2, 16, 16, 16), out_nhwc.shape
    assert jnp.allclose(out_nhwc, ref_nhwc, atol=1e-6, rtol=1e-6), "NHWC kernel mismatch"

    print("KERNEL_OK")
</pallas_src>

<mosaic_0001>
module attributes {stable_mosaic.version = 11 : i64} {
  func.func @_spp_kernel_nchw(%arg0: i32, %arg1: i32, %arg2: memref<2x4x16x16xf32, #tpu.memory_space<vmem>>, %arg3: memref<2x4x4x16x16xf32, #tpu.memory_space<vmem>>, %arg4: memref<2x4x28x28xf32, #tpu.memory_space<vmem>>, %arg5: memref<2x4x28x24xf32, #tpu.memory_space<vmem>>, %arg6: memref<2x4x24x24xf32, #tpu.memory_space<vmem>>, %arg7: memref<2x4x20x20xf32, #tpu.memory_space<vmem>>) attributes {dimension_semantics = [#tpu.dimension_semantics<parallel>, #tpu.dimension_semantics<parallel>], iteration_bounds = array<i64: 1, 1>, scalar_prefetch = 0 : i64, scratch_operands = 4 : i64, tpu.core_type = #tpu.core_type<tc>, window_params = [{transform_indices = @transform_0, window_bounds = array<i64: 2, 4, 16, 16>}, {transform_indices = @transform_1, window_bounds = array<i64: 2, 4, 4, 16, 16>}]} {
    %c0 = arith.constant 0 : index
    %c0_0 = arith.constant 0 : index
    %c0_1 = arith.constant 0 : index
    %c0_2 = arith.constant 0 : index
    %0 = vector.load %arg2[%c0, %c0_0, %c0_1, %c0_2] : memref<2x4x16x16xf32, #tpu.memory_space<vmem>>, vector<2x4x16x16xf32>
    %cst = arith.constant 0xFF800000 : f32
    %1 = vector.broadcast %cst : f32 to vector<2x4x6x28xf32>
    %c0_3 = arith.constant 0 : index
    %c0_4 = arith.constant 0 : index
    %c0_5 = arith.constant 0 : index
    %c0_6 = arith.constant 0 : index
    %2 = vector.load %arg4[%c0_3, %c0_4, %c0_5, %c0_6] : memref<2x4x28x28xf32, #tpu.memory_space<vmem>>, vector<2x4x6x28xf32>
    tpu.vector_store %arg4[%c0_3, %c0_4, %c0_5, %c0_6], %1 {strides = array<i32>} : memref<2x4x28x28xf32, #tpu.memory_space<vmem>>, vector<2x4x6x28xf32>,
    %cst_7 = arith.constant 0xFF800000 : f32
    %3 = vector.broadcast %cst_7 : f32 to vector<2x4x6x28xf32>
    %c0_8 = arith.constant 0 : index
    %c0_9 = arith.constant 0 : index
    %c22 = arith.constant 22 : index
    %c0_10 = arith.constant 0 : index
    %4 = vector.load %arg4[%c0_8, %c0_9, %c22, %c0_10] : memref<2x4x28x28xf32, #tpu.memory_space<vmem>>, vector<2x4x6x28xf32>
    tpu.vector_store %arg4[%c0_8, %c0_9, %c22, %c0_10], %3 {strides = array<i32>} : memref<2x4x28x28xf32, #tpu.memory_space<vmem>>, vector<2x4x6x28xf32>,
    %cst_11 = arith.constant 0xFF800000 : f32
    %5 = vector.broadcast %cst_11 : f32 to vector<2x4x16x6xf32>
    %c0_12 = arith.constant 0 : index
    %c0_13 = arith.constant 0 : index
    %c6 = arith.constant 6 : index
    %c0_14 = arith.constant 0 : index
    %6 = vector.load %arg4[%c0_12, %c0_13, %c6, %c0_14] : memref<2x4x28x28xf32, #tpu.memory_space<vmem>>, vector<2x4x16x6xf32>
    tpu.vector_store %arg4[%c0_12, %c0_13, %c6, %c0_14], %5 {strides = array<i32>} : memref<2x4x28x28xf32, #tpu.memory_space<vmem>>, vector<2x4x16x6xf32>,
    %cst_15 = arith.constant 0xFF800000 : f32
    %7 = vector.broadcast %cst_15 : f32 to vector<2x4x16x6xf32>
    %c0_16 = arith.constant 0 : index
    %c0_17 = arith.constant 0 : index
    %c6_18 = arith.constant 6 : index
    %c22_19 = arith.constant 22 : index
    %8 = vector.load %arg4[%c0_16, %c0_17, %c6_18, %c22_19] : memref<2x4x28x28xf32, #tpu.memory_space<vmem>>, vector<2x4x16x6xf32>
    tpu.vector_store %arg4[%c0_16, %c0_17, %c6_18, %c22_19], %7 {strides = array<i32>} : memref<2x4x28x28xf32, #tpu.memory_space<vmem>>, vector<2x4x16x6xf32>,
    %c0_20 = arith.constant 0 : index
    %c0_21 = arith.constant 0 : index
    %c6_22 = arith.constant 6 : index
    %c6_23 = arith.constant 6 : index
    %9 = vector.load %arg4[%c0_20, %c0_21, %c6_22, %c6_23] : memref<2x4x28x28xf32, #tpu.memory_space<vmem>>, vector<2x4x16x16xf32>
    tpu.vector_store %arg4[%c0_20, %c0_21, %c6_22, %c6_23], %0 {strides = array<i32>} : memref<2x4x28x28xf32, #tpu.memory_space<vmem>>, vector<2x4x16x16xf32>,
    %c0_24 = arith.constant 0 : index
    %c0_25 = arith.constant 0 : index
    %c0_26 = arith.constant 0 : index
    %c0_27 = arith.constant 0 : index
    %10 = vector.load %arg4[%c0_24, %c0_25, %c0_26, %c0_27] : memref<2x4x28x28xf32, #tpu.memory_space<vmem>>, vector<2x4x28x24xf32>
    %c0_28 = arith.constant 0 : index
    %c0_29 = arith.constant 0 : index
    %c0_30 = arith.constant 0 : index
    %c1 = arith.constant 1 : index
    %11 = vector.load %arg4[%c0_28, %c0_29, %c0_30, %c1] : memref<2x4x28x28xf32, #tpu.memory_space<vmem>>, vector<2x4x28x24xf32>
    %12 = arith.maximumf %10, %11 : vector<2x4x28x24xf32>
    %c0_31 = arith.constant 0 : index
    %c0_32 = arith.constant 0 : index
    %c0_33 = arith.constant 0 : index
    %c2 = arith.constant 2 : index
    %13 = vector.load %arg4[%c0_31, %c0_32, %c0_33, %c2] : memref<2x4x28x28xf32, #tpu.memory_space<vmem>>, vector<2x4x28x24xf32>
    %14 = arith.maximumf %12, %13 : vector<2x4x28x24xf32>
    %c0_34 = arith.constant 0 : index
    %c0_35 = arith.constant 0 : index
    %c0_36 = arith.constant 0 : index
    %c3 = arith.constant 3 : index
    %15 = vector.load %arg4[%c0_34, %c0_35, %c0_36, %c3] : memref<2x4x28x28xf32, #tpu.memory_space<vmem>>, vector<2x4x28x24xf32>
    %16 = arith.maximumf %14, %15 : vector<2x4x28x24xf32>
    %c0_37 = arith.constant 0 : index
    %c0_38 = arith.constant 0 : index
    %c0_39 = arith.constant 0 : index
    %c4 = arith.constant 4 : index
    %17 = vector.load %arg4[%c0_37, %c0_38, %c0_39, %c4] : memref<2x4x28x28xf32, #tpu.memory_space<vmem>>, vector<2x4x28x24xf32>
    %18 = arith.maximumf %16, %17 : vector<2x4x28x24xf32>
    %c0_40 = arith.constant 0 : index
    %c0_41 = arith.constant 0 : index
    %c0_42 = arith.constant 0 : index
    %c0_43 = arith.constant 0 : index
    %19 = vector.load %arg5[%c0_40, %c0_41, %c0_42, %c0_43] : memref<2x4x28x24xf32, #tpu.memory_space<vmem>>, vector<2x4x28x24xf32>
    tpu.vector_store %arg5[%c0_40, %c0_41, %c0_42, %c0_43], %18 {strides = array<i32>} : memref<2x4x28x24xf32, #tpu.memory_space<vmem>>, vector<2x4x28x24xf32>,
    %c0_44 = arith.constant 0 : index
    %c0_45 = arith.constant 0 : index
    %c0_46 = arith.constant 0 : index
    %c0_47 = arith.constant 0 : index
    %20 = vector.load %arg5[%c0_44, %c0_45, %c0_46, %c0_47] : memref<2x4x28x24xf32, #tpu.memory_space<vmem>>, vector<2x4x24x24xf32>
    %c0_48 = arith.constant 0 : index
    %c0_49 = arith.constant 0 : index
    %c1_50 = arith.constant 1 : index
    %c0_51 = arith.constant 0 : index
    %21 = vector.load %arg5[%c0_48, %c0_49, %c1_50, %c0_51] : memref<2x4x28x24xf32, #tpu.memory_space<vmem>>, vector<2x4x24x24xf32>
    %22 = arith.maximumf %20, %21 : vector<2x4x24x24xf32>
    %c0_52 = arith.constant 0 : index
    %c0_53 = arith.constant 0 : index
    %c2_54 = arith.constant 2 : index
    %c0_55 = arith.constant 0 : index
    %23 = vector.load %arg5[%c0_52, %c0_53, %c2_54, %c0_55] : memref<2x4x28x24xf32, #tpu.memory_space<vmem>>, vector<2x4x24x24xf32>
    %24 = arith.maximumf %22, %23 : vector<2x4x24x24xf32>
    %c0_56 = arith.constant 0 : index
    %c0_57 = arith.constant 0 : index
    %c3_58 = arith.constant 3 : index
    %c0_59 = arith.constant 0 : index
    %25 = vector.load %arg5[%c0_56, %c0_57, %c3_58, %c0_59] : memref<2x4x28x24xf32, #tpu.memory_space<vmem>>, vector<2x4x24x24xf32>
    %26 = arith.maximumf %24, %25 : vector<2x4x24x24xf32>
    %c0_60 = arith.constant 0 : index
    %c0_61 = arith.constant 0 : index
    %c4_62 = arith.constant 4 : index
    %c0_63 = arith.constant 0 : index
    %27 = vector.load %arg5[%c0_60, %c0_61, %c4_62, %c0_63] : memref<2x4x28x24xf32, #tpu.memory_space<vmem>>, vector<2x4x24x24xf32>
    %28 = arith.maximumf %26, %27 : vector<2x4x24x24xf32>
    %c0_64 = arith.constant 0 : index
    %c0_65 = arith.constant 0 : index
    %c0_66 = arith.constant 0 : index
    %c0_67 = arith.constant 0 : index
    %29 = vector.load %arg6[%c0_64, %c0_65, %c0_66, %c0_67] : memref<2x4x24x24xf32, #tpu.memory_space<vmem>>, vector<2x4x24x24xf32>
    tpu.vector_store %arg6[%c0_64, %c0_65, %c0_66, %c0_67], %28 {strides = array<i32>} : memref<2x4x24x24xf32, #tpu.memory_space<vmem>>, vector<2x4x24x24xf32>,
    %c0_68 = arith.constant 0 : index
    %c0_69 = arith.constant 0 : index
    %c0_70 = arith.constant 0 : index
    %c0_71 = arith.constant 0 : index
    %30 = vector.load %arg6[%c0_68, %c0_69, %c0_70, %c0_71] : memref<2x4x24x24xf32, #tpu.memory_space<vmem>>, vector<2x4x20x20xf32>
    %c0_72 = arith.constant 0 : index
    %c0_73 = arith.constant 0 : index
    %c0_74 = arith.constant 0 : index
    %c4_75 = arith.constant 4 : index
    %31 = vector.load %arg6[%c0_72, %c0_73, %c0_74, %c4_75] : memref<2x4x24x24xf32, #tpu.memory_space<vmem>>, vector<2x4x20x20xf32>
    %32 = arith.maximumf %30, %31 : vector<2x4x20x20xf32>
    %c0_76 = arith.constant 0 : index
    %c0_77 = arith.constant 0 : index
    %c4_78 = arith.constant 4 : index
    %c0_79 = arith.constant 0 : index
    %33 = vector.load %arg6[%c0_76, %c0_77, %c4_78, %c0_79] : memref<2x4x24x24xf32, #tpu.memory_space<vmem>>, vector<2x4x20x20xf32>
    %c0_80 = arith.constant 0 : index
    %c0_81 = arith.constant 0 : index
    %c4_82 = arith.constant 4 : index
    %c4_83 = arith.constant 4 : index
    %34 = vector.load %arg6[%c0_80, %c0_81, %c4_82, %c4_83] : memref<2x4x24x24xf32, #tpu.memory_space<vmem>>, vector<2x4x20x20xf32>
    %35 = arith.maximumf %33, %34 : vector<2x4x20x20xf32>
    %36 = arith.maximumf %32, %35 : vector<2x4x20x20xf32>
    %c0_84 = arith.constant 0 : index
    %c0_85 = arith.constant 0 : index
    %c0_86 = arith.constant 0 : index
    %c0_87 = arith.constant 0 : index
    %37 = vector.load %arg7[%c0_84, %c0_85, %c0_86, %c0_87] : memref<2x4x20x20xf32, #tpu.memory_space<vmem>>, vector<2x4x20x20xf32>
    tpu.vector_store %arg7[%c0_84, %c0_85, %c0_86, %c0_87], %36 {strides = array<i32>} : memref<2x4x20x20xf32, #tpu.memory_space<vmem>>, vector<2x4x20x20xf32>,
    %c0_88 = arith.constant 0 : index
    %c0_89 = arith.constant 0 : index
    %c0_90 = arith.constant 0 : index
    %c0_91 = arith.constant 0 : index
    %38 = vector.load %arg7[%c0_88, %c0_89, %c0_90, %c0_91] : memref<2x4x20x20xf32, #tpu.memory_space<vmem>>, vector<2x4x16x16xf32>
    %c0_92 = arith.constant 0 : index
    %c0_93 = arith.constant 0 : index
    %c0_94 = arith.constant 0 : index
    %c4_95 = arith.constant 4 : index
    %39 = vector.load %arg7[%c0_92, %c0_93, %c0_94, %c4_95] : memref<2x4x20x20xf32, #tpu.memory_space<vmem>>, vector<2x4x16x16xf32>
    %40 = arith.maximumf %38, %39 : vector<2x4x16x16xf32>
    %c0_96 = arith.constant 0 : index
    %c0_97 = arith.constant 0 : index
    %c4_98 = arith.constant 4 : index
    %c0_99 = arith.constant 0 : index
    %41 = vector.load %arg7[%c0_96, %c0_97, %c4_98, %c0_99] : memref<2x4x20x20xf32, #tpu.memory_space<vmem>>, vector<2x4x16x16xf32>
    %c0_100 = arith.constant 0 : index
    %c0_101 = arith.constant 0 : index
    %c4_102 = arith.constant 4 : index
    %c4_103 = arith.constant 4 : index
    %42 = vector.load %arg7[%c0_100, %c0_101, %c4_102, %c4_103] : memref<2x4x20x20xf32, #tpu.memory_space<vmem>>, vector<2x4x16x16xf32>
    %43 = arith.maximumf %41, %42 : vector<2x4x16x16xf32>
    %44 = arith.maximumf %40, %43 : vector<2x4x16x16xf32>
    %c0_104 = arith.constant 0 : index
    %c0_105 = arith.constant 0 : index
    %c4_106 = arith.constant 4 : index
    %c4_107 = arith.constant 4 : index
    %45 = vector.load %arg6[%c0_104, %c0_105, %c4_106, %c4_107] : memref<2x4x24x24xf32, #tpu.memory_space<vmem>>, vector<2x4x16x16xf32>
    %c0_108 = arith.constant 0 : index
    %c0_109 = arith.constant 0 : index
    %c2_110 = arith.constant 2 : index
    %c2_111 = arith.constant 2 : index
    %46 = vector.load %arg7[%c0_108, %c0_109, %c2_110, %c2_111] : memref<2x4x20x20xf32, #tpu.memory_space<vmem>>, vector<2x4x16x16xf32>
    %c0_112 = arith.constant 0 : index
    %c0_113 = arith.constant 0 : index
    %c0_114 = arith.constant 0 : index
    %c0_115 = arith.constant 0 : index
    %c0_116 = arith.constant 0 : index
    %47 = vector.load %arg3[%c0_112, %c0_113, %c0_114, %c0_115, %c0_116] : memref<2x4x4x16x16xf32, #tpu.memory_space<vmem>>, vector<2x1x4x16x16xf32>
    %48 = vector.shape_cast %47 : vector<2x1x4x16x16xf32> to vector<2x4x16x16xf32>
    %49 = vector.shape_cast %0 : vector<2x4x16x16xf32> to vector<2x1x4x16x16xf32>
    tpu.vector_store %arg3[%c0_112, %c0_113, %c0_114, %c0_115, %c0_116], %49 {strides = array<i32>} : memref<2x4x4x16x16xf32, #tpu.memory_space<vmem>>, vector<2x1x4x16x16xf32>,
    %c0_117 = arith.constant 0 : index
    %c1_118 = arith.constant 1 : index
    %c0_119 = arith.constant 0 : index
    %c0_120 = arith.constant 0 : index
    %c0_121 = arith.constant 0 : index
    %50 = vector.load %arg3[%c0_117, %c1_118, %c0_119, %c0_120, %c0_121] : memref<2x4x4x16x16xf32, #tpu.memory_space<vmem>>, vector<2x1x4x16x16xf32>
    %51 = vector.shape_cast %50 : vector<2x1x4x16x16xf32> to vector<2x4x16x16xf32>
    %52 = vector.shape_cast %45 : vector<2x4x16x16xf32> to vector<2x1x4x16x16xf32>
    tpu.vector_store %arg3[%c0_117, %c1_118, %c0_119, %c0_120, %c0_121], %52 {strides = array<i32>} : memref<2x4x4x16x16xf32, #tpu.memory_space<vmem>>, vector<2x1x4x16x16xf32>,
    %c0_122 = arith.constant 0 : index
    %c2_123 = arith.constant 2 : index
    %c0_124 = arith.constant 0 : index
    %c0_125 = arith.constant 0 : index
    %c0_126 = arith.constant 0 : index
    %53 = vector.load %arg3[%c0_122, %c2_123, %c0_124, %c0_125, %c0_126] : memref<2x4x4x16x16xf32, #tpu.memory_space<vmem>>, vector<2x1x4x16x16xf32>
    %54 = vector.shape_cast %53 : vector<2x1x4x16x16xf32> to vector<2x4x16x16xf32>
    %55 = vector.shape_cast %46 : vector<2x4x16x16xf32> to vector<2x1x4x16x16xf32>
    tpu.vector_store %arg3[%c0_122, %c2_123, %c0_124, %c0_125, %c0_126], %55 {strides = array<i32>} : memref<2x4x4x16x16xf32, #tpu.memory_space<vmem>>, vector<2x1x4x16x16xf32>,
    %c0_127 = arith.constant 0 : index
    %c3_128 = arith.constant 3 : index
    %c0_129 = arith.constant 0 : index
    %c0_130 = arith.constant 0 : index
    %c0_131 = arith.constant 0 : index
    %56 = vector.load %arg3[%c0_127, %c3_128, %c0_129, %c0_130, %c0_131] : memref<2x4x4x16x16xf32, #tpu.memory_space<vmem>>, vector<2x1x4x16x16xf32>
    %57 = vector.shape_cast %56 : vector<2x1x4x16x16xf32> to vector<2x4x16x16xf32>
    %58 = vector.shape_cast %44 : vector<2x4x16x16xf32> to vector<2x1x4x16x16xf32>
    tpu.vector_store %arg3[%c0_127, %c3_128, %c0_129, %c0_130, %c0_131], %58 {strides = array<i32>} : memref<2x4x4x16x16xf32, #tpu.memory_space<vmem>>, vector<2x1x4x16x16xf32>,
    return
  }
  func.func @transform_0(%arg0: i32, %arg1: i32) -> (i32, i32, i32, i32) {
    %c0_i32 = arith.constant 0 : i32
    %c0_i32_0 = arith.constant 0 : i32
    %c0_i32_1 = arith.constant 0 : i32
    return %arg0, %arg1, %c0_i32, %c0_i32_0 : i32, i32, i32, i32
  }
  func.func @transform_1(%arg0: i32, %arg1: i32) -> (i32, i32, i32, i32, i32) {
    %c0_i32 = arith.constant 0 : i32
    %c0_i32_0 = arith.constant 0 : i32
    %c0_i32_1 = arith.constant 0 : i32
    %c0_i32_2 = arith.constant 0 : i32
    return %arg0, %c0_i32, %arg1, %c0_i32_0, %c0_i32_1 : i32, i32, i32, i32, i32
  }
}

</mosaic_0001>

<bundles_post_ra>
// kernel: spatial_pyramid_pooling.1
= control target key start
LH: loop header
LB: loop body
LE: loop exit
PB: predicated region body
PF: predicated region fallthrough
CT: control target
= control target key end

     0   :  { %6 = vsyncpa [#allocation7], 0  ;;  %s3270_s0 = inlined_call_operand.hbm [shape: f32[2,4,16,16], index: 0, kind: input, shape index: {}]   ;;  %s3271_s1 = inlined_call_operand.hbm [shape: f32[2,4,4,16,16], index: 1, kind: output, shape index: {}]  }
   0x1   :  { %7 = vsyncpa [#allocation8], 0  ;;  %s1868_s6 = smov [#allocation6]  }
   0x2   :  { %s13_s7 = sshll.u32 %s1868_s6, 4  ;;  %s14_s7 = int_to_ptr.vmem [resolvable:$true] %s13_s7 }
   0x3   :  { %s1832_s8 = scalar_lea.vmem %s14_s7, 2048  ;;  %p1837_p1 = scmp.lt.s32.totalorder %s14_s7, %s14_s7 }
   0x4   :  { %p1833_p0 = scmp.ne.s32.totalorder %s14_s7, %s1832_s8  ;;  %p1838_p2 = scmp.lt.s32.totalorder %s1832_s8, %s1832_s8 }
   0x6   :  { %p1839_p3 = por %p1838_p2, %p1837_p1 }
   0x8   :  { %p1840_p4 = pnand %p1839_p3, %p1833_p0 }
   0xa   :  { %1843 = shalt.err (!%p1840_p4)
}
   0xb   :  { %s1869_s9 = smov 128   ;;  %s1870_s10 = smov 8  }
   0xc   :  { %19 = dma.hbm_to_vmem [thread:$0]  %s3270_s0, 2048, %s14_s7, [#allocation7], %s1869_s9, %s1869_s9, %s1870_s10  }
   0xd   :  { %1864 = dma.done.wait [#allocation7], 2048  }
   0xe   :  { %1865 = vsyncadd [#allocation7], 4294965248  ;;  %vm39_vm0 = vcmask 226304   ;;  %v1871_v0 = vmov -inf   ;;  %vm56_vm1 = vcmask 48128   ;;  %vm73_vm2 = vcmask 228528  }
   0xf   :  { %48 = vst.msk [vmem:[#allocation2 + $0x16] sm:$0x3f] %vm39_vm0, %v1871_v0  ;;  %40 = vst.msk [vmem:[#allocation2] sm:$0x3f] %vm39_vm0, %v1871_v0  ;;  %v23_v1 = vld [vmem:[#allocation6] sm:$0xff]  ;;  %vm1599_vm3 = vcmask 130048  }
  0x10   :  { %41 = vst.msk [vmem:[#allocation2 + $0x20] sm:$0x3f] %vm39_vm0, %v1871_v0  ;;  %42 = vst.msk [vmem:[#allocation2 + $0x40] sm:$0x3f] %vm39_vm0, %v1871_v0  ;;  %v25_v2 = vld [vmem:[#allocation6 + $0x10] sm:$0xff]  ;;  %v24_v3 = vld [vmem:[#allocation6 + $0x8] sm:$0xff] }
  0x11   :  { %43 = vst.msk [vmem:[#allocation2 + $0x60] sm:$0x3f] %vm39_vm0, %v1871_v0  ;;  %44 = vst.msk [vmem:[#allocation2 + $0x80] sm:$0x3f] %vm39_vm0, %v1871_v0  ;;  %s1872_s0 = smov 6   ;;  %v26_v4 = vld [vmem:[#allocation6 + $0x18] sm:$0xff] }
  0x12   :  { %45 = vst.msk [vmem:[#allocation2 + $0xa0] sm:$0x3f] %vm39_vm0, %v1871_v0  ;;  %46 = vst.msk [vmem:[#allocation2 + $0xc0] sm:$0x3f] %vm39_vm0, %v1871_v0  ;;  %106 = vrot.lane.b32.xlu0 %v23_v1, %s1872_s0  ;;  %110 = vrot.lane.b32.xlu1 %v25_v2, %s1872_s0  ;;  %v28_v5 = vld [vmem:[#allocation6 + $0x28] sm:$0xff]  ;;  %v27_v6 = vld [vmem:[#allocation6 + $0x20] sm:$0xff] }
  0x13   :  { %47 = vst.msk [vmem:[#allocation2 + $0xe0] sm:$0x3f] %vm39_vm0, %v1871_v0  ;;  %49 = vst.msk [vmem:[#allocation2 + $0x36] sm:$0x3f] %vm39_vm0, %v1871_v0  ;;  %v30_v7 = vld [vmem:[#allocation6 + $0x38] sm:$0xff]  ;;  %v29_v8 = vld [vmem:[#allocation6 + $0x30] sm:$0xff] }
  0x14   :  { %50 = vst.msk [vmem:[#allocation2 + $0x56] sm:$0x3f] %vm39_vm0, %v1871_v0  ;;  %51 = vst.msk [vmem:[#allocation2 + $0x76] sm:$0x3f] %vm39_vm0, %v1871_v0  ;;  %v32_v9 = vld [vmem:[#allocation6 + $0x48] sm:$0xff]  ;;  %v31_v10 = vld [vmem:[#allocation6 + $0x40] sm:$0xff] }
  0x15   :  { %52 = vst.msk [vmem:[#allocation2 + $0x96] sm:$0x3f] %vm39_vm0, %v1871_v0  ;;  %53 = vst.msk [vmem:[#allocation2 + $0xb6] sm:$0x3f] %vm39_vm0, %v1871_v0  ;;  %v34_v11 = vld [vmem:[#allocation6 + $0x58] sm:$0xff]  ;;  %v33_v12 = vld [vmem:[#allocation6 + $0x50] sm:$0xff] }
  0x16   :  { %54 = vst.msk [vmem:[#allocation2 + $0xd6] sm:$0x3f] %vm39_vm0, %v1871_v0  ;;  %55 = vst.msk [vmem:[#allocation2 + $0xf6] sm:$0x3f] %vm39_vm0, %v1871_v0  ;;  %v36_v13 = vld [vmem:[#allocation6 + $0x68] sm:$0xff]  ;;  %v35_v14 = vld [vmem:[#allocation6 + $0x60] sm:$0xff]  ;;  %108 = vrot.lane.b32.xlu0 %v24_v3, %s1872_s0  ;;  %112 = vrot.lane.b32.xlu1 %v26_v4, %s1872_s0 }
  0x17   :  { %57 = vst.msk [vmem:[#allocation2 + $0x6] sm:$0xff] %vm56_vm1, %v1871_v0  ;;  %58 = vst.msk [vmem:[#allocation2 + $0xe] sm:$0xff] %vm56_vm1, %v1871_v0  ;;  %v38_v15 = vld [vmem:[#allocation6 + $0x78] sm:$0xff]  ;;  %v37_v16 = vld [vmem:[#allocation6 + $0x70] sm:$0xff]  ;;  %s1873_s13 = smov 127   ;;  %s1874_s14 = smov 126  }
  0x18   :  { %59 = vst.msk [vmem:[#allocation2 + $0x26] sm:$0xff] %vm56_vm1, %v1871_v0  ;;  %60 = vst.msk [vmem:[#allocation2 + $0x2e] sm:$0xff] %vm56_vm1, %v1871_v0  ;;  %v1974_v17 = vld [vmem:[#allocation2 + $0x18] sm:$0xf]  ;;  %vm154_vm4 = vcmask 179248   ;;  %s1875_s15 = smov 125  }
  0x19   :  { %61 = vst.msk [vmem:[#allocation2 + $0x46] sm:$0xff] %vm56_vm1, %v1871_v0  ;;  %62 = vst.msk [vmem:[#allocation2 + $0x4e] sm:$0xff] %vm56_vm1, %v1871_v0  ;;  %s1876_s16 = smov 124   ;;  %vm747_vm5 = vcmask 195584   ;;  %vm751_vm6 = vcmask 191488   ;;  %vm1333_vm7 = vcmask 162816  }
  0x1a   :  { %63 = vst.msk [vmem:[#allocation2 + $0x66] sm:$0xff] %vm56_vm1, %v1871_v0  ;;  %64 = vst.msk [vmem:[#allocation2 + $0x6e] sm:$0xff] %vm56_vm1, %v1871_v0  ;;  %116 = vrot.lane.b32.xlu1 %v28_v5, %s1872_s0  ;;  %114 = vrot.lane.b32.xlu0 %v27_v6, %s1872_s0  ;;  %v1978_v18 = vld [vmem:[#allocation2 + $0x38] sm:$0xf]  ;;  %vm1336_vm8 = vcmask 158720   ;;  %s1877_s17 = smov [#allocation9]  }
  0x1b   :  { %65 = vst.msk [vmem:[#allocation2 + $0x86] sm:$0xff] %vm56_vm1, %v1871_v0  ;;  %66 = vst.msk [vmem:[#allocation2 + $0x8e] sm:$0xff] %vm56_vm1, %v1871_v0  ;;  %v1982_v19 = vld [vmem:[#allocation2 + $0x58] sm:$0xf]  ;;  %s1800_s18 = sshll.u32 %s1877_s17, 4  ;;  %s1801_s18 = int_to_ptr.vmem [resolvable:$true] %s1800_s18 }
  0x1c   :  { %67 = vst.msk [vmem:[#allocation2 + $0xa6] sm:$0xff] %vm56_vm1, %v1871_v0  ;;  %68 = vst.msk [vmem:[#allocation2 + $0xae] sm:$0xff] %vm56_vm1, %v1871_v0  ;;  %v1986_v20 = vld [vmem:[#allocation2 + $0x78] sm:$0xf]  ;;  %s1844_s19 = scalar_lea.vmem %s1801_s18, 8192  ;;  %p1849_p6 = scmp.lt.s32.totalorder %s1801_s18, %s1801_s18 }
  0x1d   :  { %69 = vst.msk [vmem:[#allocation2 + $0xc6] sm:$0xff] %vm56_vm1, %v1871_v0  ;;  %70 = vst.msk [vmem:[#allocation2 + $0xce] sm:$0xff] %vm56_vm1, %v1871_v0  ;;  %v1990_v21 = vld [vmem:[#allocation2 + $0x98] sm:$0xf]  ;;  %p1845_p5 = scmp.ne.s32.totalorder %s1801_s18, %s1844_s19  ;;  %p1850_p7 = scmp.lt.s32.totalorder %s1844_s19, %s1844_s19 }
  0x1e   :  { %71 = vst.msk [vmem:[#allocation2 + $0xe6] sm:$0xff] %vm56_vm1, %v1871_v0  ;;  %72 = vst.msk [vmem:[#allocation2 + $0xee] sm:$0xff] %vm56_vm1, %v1871_v0  ;;  %120 = vrot.lane.b32.xlu1 %v30_v7, %s1872_s0  ;;  %118 = vrot.lane.b32.xlu0 %v29_v8, %s1872_s0  ;;  %v1994_v22 = vld [vmem:[#allocation2 + $0xb8] sm:$0xf] }
  0x1f   :  { %74 = vst.msk [vmem:[#allocation2 + $0x6] sm:$0xff] %vm73_vm2, %v1871_v0  ;;  %75 = vst.msk [vmem:[#allocation2 + $0xe] sm:$0xff] %vm73_vm2, %v1871_v0  ;;  %v1998_v23 = vld [vmem:[#allocation2 + $0xd8] sm:$0xf]  ;;  %p1851_p8 = por %p1850_p7, %p1849_p6 }
  0x20   :  { %76 = vst.msk [vmem:[#allocation2 + $0x26] sm:$0xff] %vm73_vm2, %v1871_v0  ;;  %77 = vst.msk [vmem:[#allocation2 + $0x2e] sm:$0xff] %vm73_vm2, %v1871_v0  ;;  %v2002_v24 = vld [vmem:[#allocation2 + $0xf8] sm:$0xf] }
  0x21   :  { %78 = vst.msk [vmem:[#allocation2 + $0x46] sm:$0xff] %vm73_vm2, %v1871_v0  ;;  %79 = vst.msk [vmem:[#allocation2 + $0x4e] sm:$0xff] %vm73_vm2, %v1871_v0  ;;  %p1852_p9 = pnand %p1851_p8, %p1845_p5 }
  0x22   :  { %80 = vst.msk [vmem:[#allocation2 + $0x66] sm:$0xff] %vm73_vm2, %v1871_v0  ;;  %81 = vst.msk [vmem:[#allocation2 + $0x6e] sm:$0xff] %vm73_vm2, %v1871_v0  ;;  %124 = vrot.lane.b32.xlu1 %v32_v9, %s1872_s0  ;;  %122 = vrot.lane.b32.xlu0 %v31_v10, %s1872_s0 }
  0x23   :  { %82 = vst.msk [vmem:[#allocation2 + $0x86] sm:$0xff] %vm73_vm2, %v1871_v0  ;;  %83 = vst.msk [vmem:[#allocation2 + $0x8e] sm:$0xff] %vm73_vm2, %v1871_v0 }
  0x24   :  { %84 = vst.msk [vmem:[#allocation2 + $0xa6] sm:$0xff] %vm73_vm2, %v1871_v0  ;;  %85 = vst.msk [vmem:[#allocation2 + $0xae] sm:$0xff] %vm73_vm2, %v1871_v0 }
  0x25   :  { %86 = vst.msk [vmem:[#allocation2 + $0xc6] sm:$0xff] %vm73_vm2, %v1871_v0  ;;  %87 = vst.msk [vmem:[#allocation2 + $0xce] sm:$0xff] %vm73_vm2, %v1871_v0 }
  0x26   :  { %88 = vst.msk [vmem:[#allocation2 + $0xe6] sm:$0xff] %vm73_vm2, %v1871_v0  ;;  %89 = vst.msk [vmem:[#allocation2 + $0xee] sm:$0xff] %vm73_vm2, %v1871_v0  ;;  %128 = vrot.lane.b32.xlu1 %v34_v11, %s1872_s0  ;;  %126 = vrot.lane.b32.xlu0 %v33_v12, %s1872_s0 }
  0x27   :  { %1600 = vst.msk [vmem:[#allocation9] sm:$0xff] %vm1599_vm3, %v23_v1  ;;  %1602 = vst.msk [vmem:[#allocation9 + $0x10] sm:$0xff] %vm1599_vm3, %v25_v2 }
  0x28   :  { %1601 = vst.msk [vmem:[#allocation9 + $0x8] sm:$0xff] %vm1599_vm3, %v24_v3  ;;  %1603 = vst.msk [vmem:[#allocation9 + $0x18] sm:$0xff] %vm1599_vm3, %v26_v4 }
  0x29   :  { %1605 = vst.msk [vmem:[#allocation9 + $0x28] sm:$0xff] %vm1599_vm3, %v28_v5  ;;  %1604 = vst.msk [vmem:[#allocation9 + $0x20] sm:$0xff] %vm1599_vm3, %v27_v6 }
  0x2a   :  { %1607 = vst.msk [vmem:[#allocation9 + $0x38] sm:$0xff] %vm1599_vm3, %v30_v7  ;;  %1606 = vst.msk [vmem:[#allocation9 + $0x30] sm:$0xff] %vm1599_vm3, %v29_v8  ;;  %132 = vrot.lane.b32.xlu1 %v36_v13, %s1872_s0  ;;  %130 = vrot.lane.b32.xlu0 %v35_v14, %s1872_s0 }
  0x2b   :  { %1609 = vst.msk [vmem:[#allocation9 + $0x108] sm:$0xff] %vm1599_vm3, %v32_v9  ;;  %1608 = vst.msk [vmem:[#allocation9 + $0x100] sm:$0xff] %vm1599_vm3, %v31_v10 }
  0x2c   :  { %1611 = vst.msk [vmem:[#allocation9 + $0x118] sm:$0xff] %vm1599_vm3, %v34_v11  ;;  %1610 = vst.msk [vmem:[#allocation9 + $0x110] sm:$0xff] %vm1599_vm3, %v33_v12 }
  0x2d   :  { %1613 = vst.msk [vmem:[#allocation9 + $0x128] sm:$0xff] %vm1599_vm3, %v36_v13  ;;  %1612 = vst.msk [vmem:[#allocation9 + $0x120] sm:$0xff] %vm1599_vm3, %v35_v14 }
  0x2e   :  { %1615 = vst.msk [vmem:[#allocation9 + $0x138] sm:$0xff] %vm1599_vm3, %v38_v15  ;;  %1614 = vst.msk [vmem:[#allocation9 + $0x130] sm:$0xff] %vm1599_vm3, %v37_v16  ;;  %136 = vrot.lane.b32.xlu1 %v38_v15, %s1872_s0  ;;  %134 = vrot.lane.b32.xlu0 %v37_v16, %s1872_s0 }
  0x2f   :  { %3308 = vst [vmem:[#allocation12_spill] sm:$0xff] %v1998_v23  ;;  %3309 = vst [vmem:[#allocation13_spill] sm:$0xff] %v2002_v24 }
  0x32   :  { %241 = vrot.lane.b32.xlu1 %v1974_v17, %s1873_s13 }
  0x36   :  { %249 = vrot.lane.b32.xlu1 %v1978_v18, %s1873_s13 }
  0x3a   :  { %257 = vrot.lane.b32.xlu1 %v1982_v19, %s1873_s13 }
  0x3e   :  { %265 = vrot.lane.b32.xlu1 %v1986_v20, %s1873_s13 }
  0x42   :  { %273 = vrot.lane.b32.xlu1 %v1990_v21, %s1873_s13 }
  0x46   :  { %281 = vrot.lane.b32.xlu1 %v1994_v22, %s1873_s13 }
  0x4a   :  { %289 = vrot.lane.b32.xlu1 %v1998_v23, %s1873_s13 }
  0x4e   :  { %297 = vrot.lane.b32.xlu1 %v2002_v24, %s1873_s13 }
  0x52   :  { %369 = vrot.lane.b32.xlu1 %v1974_v17, %s1874_s14 }
  0x56   :  { %377 = vrot.lane.b32.xlu1 %v1978_v18, %s1874_s14 }
  0x5a   :  { %385 = vrot.lane.b32.xlu1 %v1982_v19, %s1874_s14 }
  0x5e   :  { %393 = vrot.lane.b32.xlu1 %v1986_v20, %s1874_s14 }
  0x84   :  { %v107_v25 = vpop.permute.xlu0 %106  ;;  %v111_v26 = vpop.permute.xlu1 %110 }
  0x85   :  { %155 = vst.msk [vmem:[#allocation2 + $0x6] sm:$0xff] %vm154_vm4, %v107_v25  ;;  %157 = vst.msk [vmem:[#allocation2 + $0x26] sm:$0xff] %vm154_vm4, %v111_v26 }
  0x88   :  { %v109_v27 = vpop.permute.xlu0 %108  ;;  %v113_v28 = vpop.permute.xlu1 %112 }
  0x89   :  { %156 = vst.msk [vmem:[#allocation2 + $0xe] sm:$0xff] %vm154_vm4, %v109_v27  ;;  %158 = vst.msk [vmem:[#allocation2 + $0x2e] sm:$0xff] %vm154_vm4, %v113_v28 }
  0x8c   :  { %v2018_v29 = vld [vmem:[#allocation2] sm:$0xff]  ;;  %v117_v30 = vpop.permute.xlu1 %116  ;;  %v115_v31 = vpop.permute.xlu0 %114 }
  0x8d   :  { %235 = vrot.lane.b32.xlu0 %v2018_v29, %s1873_s13  ;;  %160 = vst.msk [vmem:[#allocation2 + $0x4e] sm:$0xff] %vm154_vm4, %v117_v30  ;;  %159 = vst.msk [vmem:[#allocation2 + $0x46] sm:$0xff] %vm154_vm4, %v115_v31  ;;  %v2034_v36 = vld [vmem:[#allocation2 + $0x20] sm:$0xff] }
  0x8e   :  { %3310 = vst [vmem:[#allocation14_spill] sm:$0xff] %v2034_v36 }
  0x90   :  { %v2024_v32 = vld [vmem:[#allocation2 + $0x10] sm:$0xff]  ;;  %v2026_v33 = vld [vmem:[#allocation2 + $0x8] sm:$0xff]  ;;  %v121_v34 = vpop.permute.xlu1 %120  ;;  %v119_v35 = vpop.permute.xlu0 %118 }
  0x91   :  { %239 = vrot.lane.b32.xlu0 %v2024_v32, %s1873_s13  ;;  %237 = vrot.lane.b32.xlu1 %v2026_v33, %s1873_s13  ;;  %162 = vst.msk [vmem:[#allocation2 + $0x6e] sm:$0xff] %vm154_vm4, %v121_v34  ;;  %161 = vst.msk [vmem:[#allocation2 + $0x66] sm:$0xff] %vm154_vm4, %v119_v35  ;;  %v2036_v37 = vld [vmem:[#allocation2 + $0x28] sm:$0xff]  ;;  %v2044_v40 = vld [vmem:[#allocation2 + $0x30] sm:$0xff] }
  0x92   :  { %3311 = vst [vmem:[#allocation15_spill] sm:$0xff] %v2044_v40 }
  0x94   :  { %v125_v38 = vpop.permute.xlu1 %124  ;;  %v123_v39 = vpop.permute.xlu0 %122  ;;  %v2046_v41 = vld [vmem:[#allocation2 + $0x48] sm:$0xff]  ;;  %v2054_v44 = vld [vmem:[#allocation2 + $0x40] sm:$0xff]  ;;  %v2064_v48 = vld [vmem:[#allocation2 + $0x50] sm:$0xff] }
  0x95   :  { %243 = vrot.lane.b32.xlu0 %v2034_v36, %s1873_s13  ;;  %245 = vrot.lane.b32.xlu1 %v2036_v37, %s1873_s13  ;;  %164 = vst.msk [vmem:[#allocation2 + $0x8e] sm:$0xff] %vm154_vm4, %v125_v38  ;;  %163 = vst.msk [vmem:[#allocation2 + $0x86] sm:$0xff] %vm154_vm4, %v123_v39 }
  0x96   :  { %3312 = vst [vmem:[#allocation16_spill] sm:$0xff] %v2054_v44  ;;  %3313 = vst [vmem:[#allocation17_spill] sm:$0xff] %v2064_v48 }
  0x98   :  { %v129_v42 = vpop.permute.xlu1 %128  ;;  %v127_v43 = vpop.permute.xlu0 %126  ;;  %v2056_v45 = vld [vmem:[#allocation2 + $0x68] sm:$0xff]  ;;  %v2074_v52 = vld [vmem:[#allocation2 + $0x60] sm:$0xff]  ;;  %v2082_v54 = vld [vmem:[#allocation2 + $0x70] sm:$0xff] }
  0x99   :  { %247 = vrot.lane.b32.xlu0 %v2044_v40, %s1873_s13  ;;  %253 = vrot.lane.b32.xlu1 %v2046_v41, %s1873_s13  ;;  %166 = vst.msk [vmem:[#allocation2 + $0xae] sm:$0xff] %vm154_vm4, %v129_v42  ;;  %165 = vst.msk [vmem:[#allocation2 + $0xa6] sm:$0xff] %vm154_vm4, %v127_v43 }
  0x9a   :  { %3314 = vst [vmem:[#allocation18_spill] sm:$0xff] %v2074_v52  ;;  %3315 = vst [vmem:[#allocation19_spill] sm:$0xff] %v2082_v54 }
  0x9c   :  { %v133_v46 = vpop.permute.xlu1 %132  ;;  %v131_v47 = vpop.permute.xlu0 %130  ;;  %v2066_v49 = vld [vmem:[#allocation2 + $0x88] sm:$0xff]  ;;  %v2090_v56 = vld [vmem:[#allocation2 + $0x80] sm:$0xff]  ;;  %v2098_v58 = vld [vmem:[#allocation2 + $0x90] sm:$0xff] }
  0x9d   :  { %251 = vrot.lane.b32.xlu0 %v2054_v44, %s1873_s13  ;;  %261 = vrot.lane.b32.xlu1 %v2056_v45, %s1873_s13  ;;  %168 = vst.msk [vmem:[#allocation2 + $0xce] sm:$0xff] %vm154_vm4, %v133_v46  ;;  %167 = vst.msk [vmem:[#allocation2 + $0xc6] sm:$0xff] %vm154_vm4, %v131_v47 }
  0x9e   :  { %3317 = vst [vmem:[#allocation21_spill] sm:$0xff] %v2090_v56  ;;  %3319 = vst [vmem:[#allocation23_spill] sm:$0xff] %v2098_v58 }
  0xa0   :  { %v137_v50 = vpop.permute.xlu1 %136  ;;  %v135_v51 = vpop.permute.xlu0 %134  ;;  %v2076_v53 = vld [vmem:[#allocation2 + $0xa8] sm:$0xff]  ;;  %v2104_v59 = vld [vmem:[#allocation2 + $0xa0] sm:$0xff]  ;;  %v2110_v60 = vld [vmem:[#allocation2 + $0xb0] sm:$0xff] }
  0xa1   :  { %255 = vrot.lane.b32.xlu0 %v2064_v48, %s1873_s13  ;;  %269 = vrot.lane.b32.xlu1 %v2066_v49, %s1873_s13  ;;  %170 = vst.msk [vmem:[#allocation2 + $0xee] sm:$0xff] %vm154_vm4, %v137_v50  ;;  %169 = vst.msk [vmem:[#allocation2 + $0xe6] sm:$0xff] %vm154_vm4, %v135_v51 }
  0xa2   :  { %3320 = vst [vmem:[#allocation24_spill] sm:$0xff] %v2104_v59  ;;  %3321 = vst [vmem:[#allocation25_spill] sm:$0xff] %v2110_v60 }
  0xa4   :  { %v2084_v55 = vld [vmem:[#allocation2 + $0xc8] sm:$0xff]  ;;  %v2116_v61 = vld [vmem:[#allocation2 + $0xc0] sm:$0xff]  ;;  %v2118_v62 = vpop.permute.xlu1 %241  ;;  %v2124_v63 = vld [vmem:[#allocation2 + $0xd0] sm:$0xff] }
  0xa5   :  { %259 = vrot.lane.b32.xlu0 %v2074_v52, %s1873_s13  ;;  %277 = vrot.lane.b32.xlu1 %v2076_v53, %s1873_s13  ;;  %3316 = vst [vmem:[#allocation20_spill] sm:$0xff] %v2084_v55  ;;  %3322 = vst [vmem:[#allocation26_spill] sm:$0xff] %v2116_v61 }
  0xa6   :  { %3323 = vst [vmem:[#allocation27_spill] sm:$0xff] %v2124_v63 }
  0xa8   :  { %v2092_v57 = vld [vmem:[#allocation2 + $0xe8] sm:$0xff]  ;;  %v2130_v0 = vpop.permute.xlu1 %249  ;;  %v2132_v1 = vld [vmem:[#allocation2 + $0xe0] sm:$0xff]  ;;  %v2138_v2 = vld [vmem:[#allocation2 + $0xf0] sm:$0xff] }
  0xa9   :  { %263 = vrot.lane.b32.xlu0 %v2082_v54, %s1873_s13  ;;  %285 = vrot.lane.b32.xlu1 %v2084_v55, %s1873_s13  ;;  %3318 = vst [vmem:[#allocation22_spill] sm:$0xff] %v2092_v57 }
  0xac   :  { %v2140_v3 = vpop.permute.xlu1 %257 }
  0xad   :  { %267 = vrot.lane.b32.xlu0 %v2090_v56, %s1873_s13  ;;  %293 = vrot.lane.b32.xlu1 %v2092_v57, %s1873_s13 }
  0xb0   :  { %v2150_v4 = vpop.permute.xlu1 %265 }
  0xb1   :  { %271 = vrot.lane.b32.xlu0 %v2098_v58, %s1873_s13  ;;  %365 = vrot.lane.b32.xlu1 %v2026_v33, %s1874_s14 }
  0xb4   :  { %v2156_v5 = vpop.permute.xlu1 %273 }
  0xb5   :  { %275 = vrot.lane.b32.xlu0 %v2104_v59, %s1873_s13  ;;  %373 = vrot.lane.b32.xlu1 %v2036_v37, %s1874_s14 }
  0xb8   :  { %v2166_v6 = vpop.permute.xlu1 %281 }
  0xb9   :  { %279 = vrot.lane.b32.xlu0 %v2110_v60, %s1873_s13  ;;  %381 = vrot.lane.b32.xlu1 %v2046_v41, %s1874_s14 }
  0xbc   :  { %v2172_v7 = vpop.permute.xlu1 %289 }
  0xbd   :  { %283 = vrot.lane.b32.xlu0 %v2116_v61, %s1873_s13  ;;  %389 = vrot.lane.b32.xlu1 %v2056_v45, %s1874_s14  ;;  %3324 = vst [vmem:[#allocation28_spill] sm:$0xff] %v2172_v7 }
  0xc0   :  { %v2182_v8 = vpop.permute.xlu1 %297 }
  0xc1   :  { %287 = vrot.lane.b32.xlu0 %v2124_v63, %s1873_s13  ;;  %397 = vrot.lane.b32.xlu1 %v2066_v49, %s1874_s14  ;;  %3325 = vst [vmem:[#allocation29_spill] sm:$0xff] %v2182_v8 }
  0xc4   :  { %v2188_v9 = vpop.permute.xlu1 %369 }
  0xc5   :  { %401 = vrot.lane.b32.xlu1 %v1990_v21, %s1874_s14  ;;  %291 = vrot.lane.b32.xlu0 %v2132_v1, %s1873_s13 }
  0xc8   :  { %v2198_v10 = vpop.permute.xlu1 %377 }
  0xc9   :  { %405 = vrot.lane.b32.xlu1 %v2076_v53, %s1874_s14  ;;  %295 = vrot.lane.b32.xlu0 %v2138_v2, %s1873_s13 }
  0xcc   :  { %v2204_v11 = vpop.permute.xlu1 %385 }
  0xcd   :  { %409 = vrot.lane.b32.xlu1 %v1994_v22, %s1874_s14  ;;  %363 = vrot.lane.b32.xlu0 %v2018_v29, %s1874_s14 }
  0xd0   :  { %v2214_v12 = vpop.permute.xlu1 %393 }
  0xd1   :  { %413 = vrot.lane.b32.xlu1 %v2084_v55, %s1874_s14  ;;  %367 = vrot.lane.b32.xlu0 %v2024_v32, %s1874_s14 }
  0xd5   :  { %417 = vrot.lane.b32.xlu1 %v1998_v23, %s1874_s14  ;;  %371 = vrot.lane.b32.xlu0 %v2034_v36, %s1874_s14 }
  0xd9   :  { %421 = vrot.lane.b32.xlu1 %v2092_v57, %s1874_s14  ;;  %375 = vrot.lane.b32.xlu0 %v2044_v40, %s1874_s14 }
  0xdd   :  { %425 = vrot.lane.b32.xlu1 %v2002_v24, %s1874_s14  ;;  %379 = vrot.lane.b32.xlu0 %v2054_v44, %s1874_s14 }
  0xe1   :  { %493 = vrot.lane.b32.xlu1 %v2026_v33, %s1875_s15  ;;  %383 = vrot.lane.b32.xlu0 %v2064_v48, %s1874_s14 }
  0xe5   :  { %497 = vrot.lane.b32.xlu1 %v1974_v17, %s1875_s15  ;;  %387 = vrot.lane.b32.xlu0 %v2074_v52, %s1874_s14 }
  0xe9   :  { %501 = vrot.lane.b32.xlu1 %v2036_v37, %s1875_s15  ;;  %391 = vrot.lane.b32.xlu0 %v2082_v54, %s1874_s14 }
  0xed   :  { %505 = vrot.lane.b32.xlu1 %v1978_v18, %s1875_s15  ;;  %395 = vrot.lane.b32.xlu0 %v2090_v56, %s1874_s14 }
  0xf1   :  { %509 = vrot.lane.b32.xlu1 %v2046_v41, %s1875_s15  ;;  %399 = vrot.lane.b32.xlu0 %v2098_v58, %s1874_s14 }
  0xf5   :  { %513 = vrot.lane.b32.xlu1 %v1982_v19, %s1875_s15  ;;  %403 = vrot.lane.b32.xlu0 %v2104_v59, %s1874_s14 }
  0xf9   :  { %517 = vrot.lane.b32.xlu1 %v2056_v45, %s1875_s15  ;;  %407 = vrot.lane.b32.xlu0 %v2110_v60, %s1874_s14 }
  0xfd   :  { %521 = vrot.lane.b32.xlu1 %v1986_v20, %s1875_s15  ;;  %411 = vrot.lane.b32.xlu0 %v2116_v61, %s1874_s14 }
  0xff   :  { %v2216_v13 = vpop.permute.xlu0 %235 }
 0x101   :  { %525 = vrot.lane.b32.xlu1 %v2066_v49, %s1875_s15  ;;  %415 = vrot.lane.b32.xlu0 %v2124_v63, %s1874_s14 }
 0x103   :  { %v2222_v14 = vpop.permute.xlu1 %237  ;;  %v2224_v15 = vpop.permute.xlu0 %239 }
 0x105   :  { %529 = vrot.lane.b32.xlu1 %v1990_v21, %s1875_s15  ;;  %419 = vrot.lane.b32.xlu0 %v2132_v1, %s1874_s14 }
 0x107   :  { %v2230_v16 = vpop.permute.xlu1 %245  ;;  %v2232_v25 = vpop.permute.xlu0 %243 }
 0x108   :  { %3326 = vst [vmem:[#allocation30_spill] sm:$0xff] %v2232_v25 }
 0x109   :  { %533 = vrot.lane.b32.xlu1 %v2076_v53, %s1875_s15  ;;  %423 = vrot.lane.b32.xlu0 %v2138_v2, %s1874_s14 }
 0x10b   :  { %v2238_v26 = vpop.permute.xlu1 %253  ;;  %v2240_v27 = vpop.permute.xlu0 %247 }
 0x10c   :  { %3327 = vst [vmem:[#allocation31_spill] sm:$0xff] %v2240_v27 }
 0x10d   :  { %537 = vrot.lane.b32.xlu1 %v1994_v22, %s1875_s15  ;;  %491 = vrot.lane.b32.xlu0 %v2018_v29, %s1875_s15 }
 0x10f   :  { %v2246_v28 = vpop.permute.xlu1 %261  ;;  %v2248_v30 = vpop.permute.xlu0 %251 }
 0x110   :  { %3328 = vst [vmem:[#allocation32_spill] sm:$0xff] %v2248_v30 }
 0x111   :  { %541 = vrot.lane.b32.xlu1 %v2084_v55, %s1875_s15  ;;  %495 = vrot.lane.b32.xlu0 %v2024_v32, %s1875_s15 }
 0x113   :  { %v2254_v31 = vpop.permute.xlu1 %269  ;;  %v2256_v34 = vpop.permute.xlu0 %255 }
 0x114   :  { %3329 = vst [vmem:[#allocation33_spill] sm:$0xff] %v2256_v34 }
 0x115   :  { %545 = vrot.lane.b32.xlu1 %v1998_v23, %s1875_s15  ;;  %499 = vrot.lane.b32.xlu0 %v2034_v36, %s1875_s15 }
 0x117   :  { %v2262_v35 = vpop.permute.xlu1 %277  ;;  %v2264_v38 = vpop.permute.xlu0 %259 }
 0x118   :  { %3330 = vst [vmem:[#allocation34_spill] sm:$0xff] %v2264_v38 }
 0x119   :  { %549 = vrot.lane.b32.xlu1 %v2092_v57, %s1875_s15  ;;  %503 = vrot.lane.b32.xlu0 %v2044_v40, %s1875_s15 }
 0x11b   :  { %v2270_v39 = vpop.permute.xlu1 %285  ;;  %v2272_v42 = vpop.permute.xlu0 %263 }
 0x11c   :  { %3331 = vst [vmem:[#allocation35_spill] sm:$0xff] %v2270_v39  ;;  %3332 = vst [vmem:[#allocation36_spill] sm:$0xff] %v2272_v42 }
 0x11d   :  { %553 = vrot.lane.b32.xlu1 %v2002_v24, %s1875_s15  ;;  %507 = vrot.lane.b32.xlu0 %v2054_v44, %s1875_s15 }
 0x11f   :  { %v2278_v43 = vpop.permute.xlu1 %293  ;;  %v2280_v46 = vpop.permute.xlu0 %267 }
 0x120   :  { %3333 = vst [vmem:[#allocation37_spill] sm:$0xff] %v2278_v43  ;;  %3334 = vst [vmem:[#allocation38_spill] sm:$0xff] %v2280_v46 }
 0x121   :  { %621 = vrot.lane.b32.xlu1 %v2026_v33, %s1876_s16  ;;  %511 = vrot.lane.b32.xlu0 %v2064_v48, %s1875_s15 }
 0x123   :  { %v2286_v47 = vpop.permute.xlu1 %365  ;;  %v2288_v50 = vpop.permute.xlu0 %271 }
 0x124   :  { %3335 = vst [vmem:[#allocation39_spill] sm:$0xff] %v2288_v50 }
 0x125   :  { %625 = vrot.lane.b32.xlu1 %v1974_v17, %s1876_s16  ;;  %515 = vrot.lane.b32.xlu0 %v2074_v52, %s1875_s15 }
 0x127   :  { %v2294_v51 = vpop.permute.xlu1 %373  ;;  %v2296_v46 = vpop.permute.xlu0 %275 }
 0x128   :  { %3336 = vst [vmem:[#allocation40_spill] sm:$0xff] %v2296_v46 }
 0x129   :  { %629 = vrot.lane.b32.xlu1 %v2036_v37, %s1876_s16  ;;  %519 = vrot.lane.b32.xlu0 %v2082_v54, %s1875_s15 }
 0x12b   :  { %v2302_v42 = vpop.permute.xlu1 %381  ;;  %v2304_v38 = vpop.permute.xlu0 %279 }
 0x12c   :  { %3337 = vst [vmem:[#allocation41_spill] sm:$0xff] %v2304_v38 }
 0x12d   :  { %633 = vrot.lane.b32.xlu1 %v1978_v18, %s1876_s16  ;;  %523 = vrot.lane.b32.xlu0 %v2090_v56, %s1875_s15 }
 0x12f   :  { %v2310_v50 = vpop.permute.xlu1 %389  ;;  %v2312_v34 = vpop.permute.xlu0 %283 }
 0x130   :  { %3338 = vst [vmem:[#allocation42_spill] sm:$0xff] %v2312_v34 }
 0x131   :  { %637 = vrot.lane.b32.xlu1 %v2046_v41, %s1876_s16  ;;  %527 = vrot.lane.b32.xlu0 %v2098_v58, %s1875_s15 }
 0x133   :  { %v2318_v46 = vpop.permute.xlu1 %397  ;;  %v2320_v30 = vpop.permute.xlu0 %287 }
 0x134   :  { %3339 = vst [vmem:[#allocation43_spill] sm:$0xff] %v2320_v30 }
 0x135   :  { %641 = vrot.lane.b32.xlu1 %v1982_v19, %s1876_s16  ;;  %531 = vrot.lane.b32.xlu0 %v2104_v59, %s1875_s15 }
 0x137   :  { %v2326_v38 = vpop.permute.xlu1 %401  ;;  %v2328_v8 = vpop.permute.xlu0 %291 }
 0x138   :  { %3340 = vst [vmem:[#allocation44_spill] sm:$0xff] %v2328_v8 }
 0x139   :  { %645 = vrot.lane.b32.xlu1 %v2056_v45, %s1876_s16  ;;  %535 = vrot.lane.b32.xlu0 %v2110_v60, %s1875_s15 }
 0x13b   :  { %v2334_v34 = vpop.permute.xlu1 %405  ;;  %v2336_v43 = vpop.permute.xlu0 %295 }
 0x13c   :  { %3341 = vst [vmem:[#allocation45_spill] sm:$0xff] %v2336_v43 }
 0x13d   :  { %649 = vrot.lane.b32.xlu1 %v1986_v20, %s1876_s16  ;;  %539 = vrot.lane.b32.xlu0 %v2116_v61, %s1875_s15 }
 0x13f   :  { %v2342_v30 = vpop.permute.xlu1 %409  ;;  %v2344_v27 = vpop.permute.xlu0 %363 }
 0x141   :  { %653 = vrot.lane.b32.xlu1 %v2066_v49, %s1876_s16  ;;  %543 = vrot.lane.b32.xlu0 %v2124_v63, %s1875_s15 }
 0x143   :  { %v2350_v8 = vpop.permute.xlu1 %413  ;;  %v2352_v25 = vpop.permute.xlu0 %367 }
 0x144   :  { %3342 = vst [vmem:[#allocation46_spill] sm:$0xff] %v2350_v8  ;;  %3343 = vst [vmem:[#allocation47_spill] sm:$0xff] %v2352_v25 }
 0x145   :  { %657 = vrot.lane.b32.xlu1 %v1990_v21, %s1876_s16  ;;  %547 = vrot.lane.b32.xlu0 %v2132_v1, %s1875_s15 }
 0x147   :  { %v2358_v43 = vpop.permute.xlu1 %417  ;;  %v2360_v7 = vpop.permute.xlu0 %371 }
 0x148   :  { %3344 = vst [vmem:[#allocation48_spill] sm:$0xff] %v2358_v43  ;;  %3345 = vst [vmem:[#allocation49_spill] sm:$0xff] %v2360_v7 }
 0x149   :  { %661 = vrot.lane.b32.xlu1 %v2076_v53, %s1876_s16  ;;  %551 = vrot.lane.b32.xlu0 %v2138_v2, %s1875_s15 }
 0x14b   :  { %v2366_v39 = vpop.permute.xlu1 %421  ;;  %v2368_v8 = vpop.permute.xlu0 %375 }
 0x14c   :  { %3346 = vst [vmem:[#allocation50_spill] sm:$0xff] %v2366_v39  ;;  %3347 = vst [vmem:[#allocation51_spill] sm:$0xff] %v2368_v8 }
 0x14d   :  { %665 = vrot.lane.b32.xlu1 %v1994_v22, %s1876_s16  ;;  %619 = vrot.lane.b32.xlu0 %v2018_v29, %s1876_s16 }
 0x14f   :  { %v2374_v25 = vpop.permute.xlu1 %425  ;;  %v2376_v43 = vpop.permute.xlu0 %379 }
 0x150   :  { %3348 = vst [vmem:[#allocation52_spill] sm:$0xff] %v2374_v25  ;;  %3349 = vst [vmem:[#allocation53_spill] sm:$0xff] %v2376_v43 }
 0x151   :  { %669 = vrot.lane.b32.xlu1 %v2084_v55, %s1876_s16  ;;  %623 = vrot.lane.b32.xlu0 %v2024_v32, %s1876_s16 }
 0x153   :  { %v494_v7 = vpop.permute.xlu1 %493  ;;  %v2382_v39 = vpop.permute.xlu0 %383 }
 0x154   :  { %3350 = vst [vmem:[#allocation54_spill] sm:$0xff] %v2382_v39 }
 0x155   :  { %673 = vrot.lane.b32.xlu1 %v1998_v23, %s1876_s16  ;;  %627 = vrot.lane.b32.xlu0 %v2034_v36, %s1876_s16 }
 0x157   :  { %v2388_v8 = vpop.permute.xlu1 %497  ;;  %v2390_v25 = vpop.permute.xlu0 %387 }
 0x158   :  { %3351 = vst [vmem:[#allocation55_spill] sm:$0xff] %v2390_v25 }
 0x159   :  { %677 = vrot.lane.b32.xlu1 %v2092_v57, %s1876_s16  ;;  %631 = vrot.lane.b32.xlu0 %v2044_v40, %s1876_s16 }
 0x15b   :  { %v2396_v43 = vpop.permute.xlu1 %501  ;;  %v2398_v55 = vpop.permute.xlu0 %391 }
 0x15c   :  { %3352 = vst [vmem:[#allocation56_spill] sm:$0xff] %v2398_v55 }
 0x15d   :  { %681 = vrot.lane.b32.xlu1 %v2002_v24, %s1876_s16  ;;  %635 = vrot.lane.b32.xlu0 %v2054_v44, %s1876_s16 }
 0x15f   :  { %v2404_v39 = vpop.permute.xlu1 %505  ;;  %v2406_v36 = vpop.permute.xlu0 %395 }
 0x160   :  { %3353 = vst [vmem:[#allocation57_spill] sm:$0xff] %v2406_v36 }
 0x161   :  { %639 = vrot.lane.b32.xlu0 %v2064_v48, %s1876_s16 }
 0x163   :  { %v2410_v25 = vpop.permute.xlu1 %509  ;;  %v2412_v57 = vpop.permute.xlu0 %399 }
 0x164   :  { %3354 = vst [vmem:[#allocation58_spill] sm:$0xff] %v2412_v57 }
 0x165   :  { %643 = vrot.lane.b32.xlu0 %v2074_v52, %s1876_s16 }
 0x167   :  { %v2416_v55 = vpop.permute.xlu1 %513  ;;  %v2418_v24 = vpop.permute.xlu0 %403 }
 0x168   :  { %3355 = vst [vmem:[#allocation59_spill] sm:$0xff] %v2418_v24 }
 0x169   :  { %647 = vrot.lane.b32.xlu0 %v2082_v54, %s1876_s16 }
 0x16b   :  { %v2422_v44 = vpop.permute.xlu1 %517  ;;  %v2424_v36 = vpop.permute.xlu0 %407 }
 0x16c   :  { %3356 = vst [vmem:[#allocation60_spill] sm:$0xff] %v2424_v36 }
 0x16d   :  { %651 = vrot.lane.b32.xlu0 %v2090_v56, %s1876_s16 }
 0x16f   :  { %v2428_v48 = vpop.permute.xlu1 %521  ;;  %v2430_v57 = vpop.permute.xlu0 %411 }
 0x170   :  { %3357 = vst [vmem:[#allocation61_spill] sm:$0xff] %v2430_v57 }
 0x171   :  { %655 = vrot.lane.b32.xlu0 %v2098_v58, %s1876_s16 }
 0x173   :  { %v2434_v52 = vpop.permute.xlu1 %525  ;;  %v2436_v24 = vpop.permute.xlu0 %415 }
 0x174   :  { %3358 = vst [vmem:[#allocation62_spill] sm:$0xff] %v2436_v24 }
 0x175   :  { %659 = vrot.lane.b32.xlu0 %v2104_v59, %s1876_s16 }
 0x177   :  { %v2440_v54 = vpop.permute.xlu1 %529  ;;  %v2442_v36 = vpop.permute.xlu0 %419 }
 0x178   :  { %3359 = vst [vmem:[#allocation63_spill] sm:$0xff] %v2442_v36 }
 0x179   :  { %663 = vrot.lane.b32.xlu0 %v2110_v60, %s1876_s16 }
 0x17b   :  { %v2446_v56 = vpop.permute.xlu1 %533  ;;  %v2448_v57 = vpop.permute.xlu0 %423 }
 0x17c   :  { %3360 = vst [vmem:[#allocation64_spill] sm:$0xff] %v2448_v57 }
 0x17d   :  { %667 = vrot.lane.b32.xlu0 %v2116_v61, %s1876_s16 }
 0x17f   :  { %v2452_v58 = vpop.permute.xlu1 %537  ;;  %v2454_v24 = vpop.permute.xlu0 %491 }
 0x181   :  { %671 = vrot.lane.b32.xlu0 %v2124_v63, %s1876_s16  ;;  %v332_v63 = vmax.f32 %v2026_v33, %v2222_v14  ;;  %v336_v33 = vmax.f32 %v2036_v37, %v2230_v16 }
 0x183   :  { %v2458_v59 = vpop.permute.xlu1 %541  ;;  %v2460_v36 = vpop.permute.xlu0 %495 }
 0x184   :  { %3361 = vst [vmem:[#allocation65_spill] sm:$0xff] %v2458_v59  ;;  %3362 = vst [vmem:[#allocation66_spill] sm:$0xff] %v2460_v36 }
 0x185   :  { %675 = vrot.lane.b32.xlu0 %v2132_v1, %s1876_s16  ;;  %v334_v1 = vmax.f32 %v1974_v17, %v2118_v62  ;;  %v464_v62 = vmax.f32 %v336_v33, %v2294_v51 }
 0x187   :  { %v2464_v60 = vpop.permute.xlu1 %545  ;;  %v2466_v57 = vpop.permute.xlu0 %499 }
 0x188   :  { %3363 = vst [vmem:[#allocation67_spill] sm:$0xff] %v2464_v60  ;;  %3364 = vst [vmem:[#allocation68_spill] sm:$0xff] %v2466_v57  ;;  %v460_v60 = vmax.f32 %v332_v63, %v2286_v47 }
 0x189   :  { %679 = vrot.lane.b32.xlu0 %v2138_v2, %s1876_s16 }
 0x18a   :  { %v588_v57 = vmax.f32 %v460_v60, %v494_v7  ;;  %v338_v60 = vmax.f32 %v1978_v18, %v2130_v0  ;;  %v592_v7 = vmax.f32 %v464_v62, %v2396_v43  ;;  %v350_v62 = vmax.f32 %v1990_v21, %v2156_v5 }
 0x18b   :  { %v2470_v61 = vpop.permute.xlu1 %549  ;;  %v2472_v40 = vpop.permute.xlu0 %503  ;;  %v354_v5 = vmax.f32 %v1994_v22, %v2166_v6  ;;  %v3369_v22 = vld [vmem:[#allocation20_spill] sm:$0xff] }
 0x18c   :  { %3365 = vst [vmem:[#allocation69_spill] sm:$0xff] %v2470_v61  ;;  %3366 = vst [vmem:[#allocation70_spill] sm:$0xff] %v2472_v40  ;;  %v462_v61 = vmax.f32 %v334_v1, %v2188_v9 }
 0x18e   :  { %v590_v14 = vmax.f32 %v462_v61, %v2388_v8  ;;  %v340_v61 = vmax.f32 %v2046_v41, %v2238_v26 }
 0x18f   :  { %v2476_v59 = vpop.permute.xlu1 %553  ;;  %v2478_v36 = vpop.permute.xlu0 %507 }
 0x190   :  { %3367 = vst [vmem:[#allocation71_spill] sm:$0xff] %v2478_v36  ;;  %v468_v9 = vmax.f32 %v340_v61, %v2302_v42 }
 0x192   :  { %v596_v43 = vmax.f32 %v468_v9, %v2410_v25  ;;  %v346_v25 = vmax.f32 %v1986_v20, %v2150_v4  ;;  %v3370_v9 = vld [vmem:[#allocation46_spill] sm:$0xff] }
 0x193   :  { %v622_v23 = vpop.permute.xlu1 %621  ;;  %v2483_v2 = vpop.permute.xlu0 %511 }
 0x194   :  { %v716_v40 = vmax.f32 %v588_v57, %v622_v23  ;;  %v466_v57 = vmax.f32 %v338_v60, %v2198_v10 }
 0x196   :  { %749 = vst.msk [vmem:[#allocation3 + $0x8] sm:$0xff] %vm747_vm5, %v716_v40  ;;  %v594_v8 = vmax.f32 %v466_v57, %v2404_v39  ;;  %v344_v39 = vmax.f32 %v2056_v45, %v2246_v28  ;;  %v474_v45 = vmax.f32 %v346_v25, %v2214_v12  ;;  %v348_v28 = vmax.f32 %v2066_v49, %v2254_v31  ;;  %v3377_v25 = vld [vmem:[#allocation66_spill] sm:$0xff] }
 0x197   :  { %v626_v36 = vpop.permute.xlu1 %625  ;;  %v2490_v17 = vpop.permute.xlu0 %515  ;;  %v352_v31 = vmax.f32 %v2076_v53, %v2262_v35  ;;  %v482_v35 = vmax.f32 %v354_v5, %v2342_v30  ;;  %v3371_v30 = vld [vmem:[#allocation47_spill] sm:$0xff] }
 0x198   :  { %v718_v63 = vmax.f32 %v590_v14, %v626_v36  ;;  %v342_v36 = vmax.f32 %v1982_v19, %v2140_v3  ;;  %v472_v42 = vmax.f32 %v344_v39, %v2310_v50  ;;  %v602_v60 = vmax.f32 %v474_v45, %v2428_v48  ;;  %v3375_v39 = vld [vmem:[#allocation14_spill] sm:$0xff]  ;;  %v3379_v45 = vld [vmem:[#allocation49_spill] sm:$0xff] }
 0x199   :  { %v478_v48 = vmax.f32 %v350_v62, %v2326_v38  ;;  %v480_v21 = vmax.f32 %v352_v31, %v2334_v34  ;;  %v331_v38 = vmax.f32 %v2018_v29, %v2216_v13  ;;  %v333_v34 = vmax.f32 %v2024_v32, %v2224_v15  ;;  %v3374_v15 = vld [vmem:[#allocation30_spill] sm:$0xff]  ;;  %v3382_v62 = vld [vmem:[#allocation37_spill] sm:$0xff]  ;;  %v3385_v31 = vld [vmem:[#allocation68_spill] sm:$0xff] }
 0x19a   :  { %752 = vst.msk [vmem:[#allocation3 + $0x18] sm:$0xf] %vm751_vm6, %v718_v63  ;;  %v470_v41 = vmax.f32 %v342_v36, %v2204_v11  ;;  %v600_v33 = vmax.f32 %v472_v42, %v2422_v44  ;;  %v476_v44 = vmax.f32 %v348_v28, %v2318_v46  ;;  %v610_v29 = vmax.f32 %v482_v35, %v2452_v58 }
 0x19b   :  { %v630_v23 = vpop.permute.xlu1 %629  ;;  %v2497_v37 = vpop.permute.xlu0 %519  ;;  %v459_v61 = vmax.f32 %v331_v38, %v2344_v27  ;;  %v3387_v38 = vld [vmem:[#allocation51_spill] sm:$0xff] }
 0x19c   :  { %v720_v40 = vmax.f32 %v592_v7, %v630_v23  ;;  %v598_v51 = vmax.f32 %v470_v41, %v2416_v55  ;;  %v604_v63 = vmax.f32 %v476_v44, %v2434_v52  ;;  %v606_v23 = vmax.f32 %v478_v48, %v2440_v54  ;;  %v3372_v41 = vld [vmem:[#allocation28_spill] sm:$0xff]  ;;  %v3381_v44 = vld [vmem:[#allocation15_spill] sm:$0xff] }
 0x19d   :  { %v3384_v48 = vld [vmem:[#allocation67_spill] sm:$0xff] }
 0x19e   :  { %754 = vst.msk [vmem:[#allocation3 + $0x28] sm:$0xff] %vm747_vm5, %v720_v40  ;;  %v608_v40 = vmax.f32 %v480_v21, %v2446_v56  ;;  %v587_v56 = vmax.f32 %v459_v61, %v2454_v24  ;;  %v3388_v61 = vld [vmem:[#allocation29_spill] sm:$0xff] }
 0x19f   :  { %v634_v18 = vpop.permute.xlu1 %633  ;;  %v2504_v0 = vpop.permute.xlu0 %523 }
 0x1a0   :  { %v722_v16 = vmax.f32 %v594_v8, %v634_v18  ;;  %v3368_v18 = vld [vmem:[#allocation35_spill] sm:$0xff] }
 0x1a1   :  { %v356_v6 = vmax.f32 %v3369_v22, %v3368_v18 }
 0x1a2   :  { %756 = vst.msk [vmem:[#allocation3 + $0x38] sm:$0xf] %vm751_vm6, %v722_v16 }
 0x1a3   :  { %v638_v10 = vpop.permute.xlu1 %637  ;;  %v2511_v47 = vpop.permute.xlu0 %527  ;;  %v484_v16 = vmax.f32 %v356_v6, %v3370_v9  ;;  %v3390_v6 = vld [vmem:[#allocation32_spill] sm:$0xff]  ;;  %v3393_v9 = vld [vmem:[#allocation70_spill] sm:$0xff] }
 0x1a4   :  { %v724_v26 = vmax.f32 %v596_v43, %v638_v10  ;;  %v461_v43 = vmax.f32 %v333_v34, %v3371_v30 }
 0x1a6   :  { %758 = vst.msk [vmem:[#allocation3 + $0x48] sm:$0xff] %vm747_vm5, %v724_v26  ;;  %v3373_v26 = vld [vmem:[#allocation12_spill] sm:$0xff]  ;;  %v589_v24 = vmax.f32 %v461_v43, %v3377_v25  ;;  %v3396_v25 = vld [vmem:[#allocation33_spill] sm:$0xff] }
 0x1a7   :  { %v642_v19 = vpop.permute.xlu1 %641  ;;  %v2518_v3 = vpop.permute.xlu0 %531  ;;  %v358_v32 = vmax.f32 %v3373_v26, %v3372_v41  ;;  %v3394_v43 = vld [vmem:[#allocation52_spill] sm:$0xff] }
 0x1a8   :  { %v726_v1 = vmax.f32 %v598_v51, %v642_v19  ;;  %v335_v51 = vmax.f32 %v3375_v39, %v3374_v15  ;;  %v3376_v19 = vld [vmem:[#allocation65_spill] sm:$0xff] }
 0x1a9   :  { %v612_v58 = vmax.f32 %v484_v16, %v3376_v19  ;;  %v782_v39 = vld [vmem:[#allocation3 + $0x8] sm:$0xff] }
 0x1aa   :  { %760 = vst.msk [vmem:[#allocation3 + $0x58] sm:$0xf] %vm751_vm6, %v726_v1 }
 0x1ab   :  { %v646_v11 = vpop.permute.xlu1 %645  ;;  %v2525_v14 = vpop.permute.xlu0 %535 }
 0x1ac   :  { %v728_v55 = vmax.f32 %v600_v33, %v646_v11  ;;  %v3378_v33 = vld [vmem:[#allocation48_spill] sm:$0xff] }
 0x1ad   :  { %v486_v11 = vmax.f32 %v358_v32, %v3378_v33  ;;  %v3395_v32 = vld [vmem:[#allocation53_spill] sm:$0xff] }
 0x1ae   :  { %762 = vst.msk [vmem:[#allocation3 + $0x68] sm:$0xff] %vm747_vm5, %v728_v55  ;;  %v463_v55 = vmax.f32 %v335_v51, %v3379_v45 }
 0x1af   :  { %v650_v20 = vpop.permute.xlu1 %649  ;;  %v2532_v4 = vpop.permute.xlu0 %539 }
 0x1b0   :  { %v730_v50 = vmax.f32 %v602_v60, %v650_v20  ;;  %v3380_v20 = vld [vmem:[#allocation31_spill] sm:$0xff] }
 0x1b2   :  { %764 = vst.msk [vmem:[#allocation3 + $0x78] sm:$0xf] %vm751_vm6, %v730_v50  ;;  %v337_v50 = vmax.f32 %v3381_v44, %v3380_v20 }
 0x1b3   :  { %v654_v12 = vpop.permute.xlu1 %653  ;;  %v2539_v7 = vpop.permute.xlu0 %543 }
 0x1b4   :  { %v732_v49 = vmax.f32 %v604_v63, %v654_v12  ;;  %v3383_v63 = vld [vmem:[#allocation22_spill] sm:$0xff] }
 0x1b5   :  { %v360_v12 = vmax.f32 %v3383_v63, %v3382_v62 }
 0x1b6   :  { %766 = vst.msk [vmem:[#allocation3 + $0x88] sm:$0xff] %vm747_vm5, %v732_v49  ;;  %v614_v49 = vmax.f32 %v486_v11, %v3384_v48 }
 0x1b7   :  { %v658_v46 = vpop.permute.xlu1 %657  ;;  %v2546_v57 = vpop.permute.xlu0 %547 }
 0x1b8   :  { %v734_v52 = vmax.f32 %v606_v23, %v658_v46  ;;  %v591_v23 = vmax.f32 %v463_v55, %v3385_v31  ;;  %v3398_v55 = vld [vmem:[#allocation71_spill] sm:$0xff] }
 0x1ba   :  { %768 = vst.msk [vmem:[#allocation3 + $0x98] sm:$0xf] %vm751_vm6, %v734_v52  ;;  %v3386_v52 = vld [vmem:[#allocation50_spill] sm:$0xff] }
 0x1bb   :  { %v662_v53 = vpop.permute.xlu1 %661  ;;  %v2555_v54 = vpop.permute.xlu0 %551  ;;  %v488_v5 = vmax.f32 %v360_v12, %v3386_v52 }
 0x1bc   :  { %v736_v8 = vmax.f32 %v608_v40, %v662_v53  ;;  %v465_v40 = vmax.f32 %v337_v50, %v3387_v38  ;;  %v3399_v50 = vld [vmem:[#allocation54_spill] sm:$0xff] }
 0x1be   :  { %770 = vst.msk [vmem:[#allocation3 + $0xa8] sm:$0xff] %vm747_vm5, %v736_v8  ;;  %v3389_v8 = vld [vmem:[#allocation13_spill] sm:$0xff]  ;;  %v593_v16 = vmax.f32 %v465_v40, %v3393_v9  ;;  %v3402_v9 = vld [vmem:[#allocation55_spill] sm:$0xff] }
 0x1bf   :  { %v666_v13 = vpop.permute.xlu1 %665  ;;  %v620_v36 = vpop.permute.xlu0 %619  ;;  %v362_v34 = vmax.f32 %v3389_v8, %v3388_v61  ;;  %v3401_v61 = vld [vmem:[#allocation18_spill] sm:$0xff] }
 0x1c0   :  { %v738_v27 = vmax.f32 %v610_v29, %v666_v13  ;;  %v715_v10 = vmax.f32 %v587_v56, %v620_v36  ;;  %v3391_v29 = vld [vmem:[#allocation16_spill] sm:$0xff]  ;;  %v3392_v13 = vld [vmem:[#allocation69_spill] sm:$0xff] }
 0x1c1   :  { %v339_v56 = vmax.f32 %v3391_v29, %v3390_v6  ;;  %v616_v36 = vmax.f32 %v488_v5, %v3392_v13 }
 0x1c2   :  { %772 = vst.msk [vmem:[#allocation3 + $0xb8] sm:$0xf] %vm751_vm6, %v738_v27  ;;  %v490_v27 = vmax.f32 %v362_v34, %v3394_v43 }
 0x1c3   :  { %748 = vst.msk [vmem:[#allocation3] sm:$0xff] %vm747_vm5, %v715_v10  ;;  %v670_v42 = vpop.permute.xlu1 %669  ;;  %v624_v1 = vpop.permute.xlu0 %623  ;;  %v467_v15 = vmax.f32 %v339_v56, %v3395_v32 }
 0x1c4   :  { %v740_v28 = vmax.f32 %v612_v58, %v670_v42  ;;  %v717_v60 = vmax.f32 %v589_v24, %v624_v1  ;;  %v3397_v24 = vld [vmem:[#allocation17_spill] sm:$0xff]  ;;  %v618_v45 = vmax.f32 %v490_v27, %v2476_v59 }
 0x1c5   :  { %v341_v42 = vmax.f32 %v3397_v24, %v3396_v25 }
 0x1c6   :  { %774 = vst.msk [vmem:[#allocation3 + $0xc8] sm:$0xff] %vm747_vm5, %v740_v28  ;;  %750 = vst.msk [vmem:[#allocation3 + $0x10] sm:$0xff] %vm747_vm5, %v717_v60  ;;  %v595_v28 = vmax.f32 %v467_v15, %v3398_v55  ;;  %v3405_v55 = vld [vmem:[#allocation56_spill] sm:$0xff] }
 0x1c7   :  { %v674_v46 = vpop.permute.xlu1 %673  ;;  %v628_v21 = vpop.permute.xlu0 %627  ;;  %v469_v62 = vmax.f32 %v341_v42, %v3399_v50 }
 0x1c8   :  { %v742_v53 = vmax.f32 %v614_v49, %v674_v46  ;;  %v719_v35 = vmax.f32 %v591_v23, %v628_v21 }
 0x1c9   :  { %v597_v34 = vmax.f32 %v469_v62, %v2483_v2 }
 0x1ca   :  { %v781_v18 = vld [vmem:[#allocation3] sm:$0xff]  ;;  %776 = vst.msk [vmem:[#allocation3 + $0xd8] sm:$0xf] %vm751_vm6, %v742_v53 }
 0x1cb   :  { %v805_v22 = vld [vmem:[#allocation3 + $0x1] sm:$0xff]  ;;  %753 = vst.msk [vmem:[#allocation3 + $0x20] sm:$0xff] %vm747_vm5, %v719_v35  ;;  %v678_v41 = vpop.permute.xlu1 %677  ;;  %v632_v26 = vpop.permute.xlu0 %631  ;;  %v3400_v35 = vld [vmem:[#allocation34_spill] sm:$0xff] }
 0x1cc   :  { %v829_v30 = vmax.f32 %v781_v18, %v805_v22  ;;  %v853_v10 = vld [vmem:[#allocation3 + $0x2] sm:$0xff]  ;;  %v744_v19 = vmax.f32 %v616_v36, %v678_v41  ;;  %v721_v58 = vmax.f32 %v593_v16, %v632_v26  ;;  %v343_v8 = vmax.f32 %v3401_v61, %v3400_v35 }
 0x1cd   :  { %v901_v1 = vld [vmem:[#allocation3 + $0x3] sm:$0xff]  ;;  %v783_v33 = vld [vmem:[#allocation3 + $0x10] sm:$0xff] }
 0x1ce   :  { %v877_v51 = vmax.f32 %v829_v30, %v853_v10  ;;  %v806_v11 = vld [vmem:[#allocation3 + $0x9] sm:$0xff]  ;;  %v807_v20 = vld [vmem:[#allocation3 + $0x11] sm:$0xff]  ;;  %778 = vst.msk [vmem:[#allocation3 + $0xe8] sm:$0xff] %vm747_vm5, %v744_v19  ;;  %755 = vst.msk [vmem:[#allocation3 + $0x30] sm:$0xff] %vm747_vm5, %v721_v58  ;;  %v471_v16 = vmax.f32 %v343_v8, %v3402_v9 }
 0x1cf   :  { %v830_v44 = vmax.f32 %v782_v39, %v806_v11  ;;  %v949_v63 = vld [vmem:[#allocation3 + $0x4] sm:$0xff]  ;;  %v831_v12 = vmax.f32 %v783_v33, %v807_v20  ;;  %v682_v49 = vpop.permute.xlu1 %681  ;;  %v636_v31 = vpop.permute.xlu0 %635  ;;  %v855_v46 = vld [vmem:[#allocation3 + $0x12] sm:$0xff] }
 0x1d0   :  { %v925_v60 = vmax.f32 %v877_v51, %v901_v1  ;;  %v854_v48 = vld [vmem:[#allocation3 + $0xa] sm:$0xff]  ;;  %v746_v59 = vmax.f32 %v618_v45, %v682_v49  ;;  %v723_v52 = vmax.f32 %v595_v28, %v636_v31  ;;  %v903_v18 = vld [vmem:[#allocation3 + $0x13] sm:$0xff]  ;;  %v3403_v39 = vld [vmem:[#allocation36_spill] sm:$0xff]  ;;  %v599_v58 = vmax.f32 %v471_v16, %v2490_v17 }
 0x1d1   :  { %v878_v21 = vmax.f32 %v830_v44, %v854_v48  ;;  %v879_v5 = vmax.f32 %v831_v12, %v855_v46  ;;  %v902_v38 = vld [vmem:[#allocation3 + $0xb] sm:$0xff]  ;;  %v951_v43 = vld [vmem:[#allocation3 + $0x14] sm:$0xff] }
 0x1d2   :  { %v973_v23 = vmax.f32 %v925_v60, %v949_v63  ;;  %v784_v40 = vld [vmem:[#allocation3 + $0x20] sm:$0xff]  ;;  %780 = vst.msk [vmem:[#allocation3 + $0xf8] sm:$0xf] %vm751_vm6, %v746_v59  ;;  %v950_v56 = vld [vmem:[#allocation3 + $0xc] sm:$0xff]  ;;  %v3404_v51 = vld [vmem:[#allocation19_spill] sm:$0xff] }
 0x1d3   :  { %v808_v53 = vld [vmem:[#allocation3 + $0x21] sm:$0xff]  ;;  %v926_v22 = vmax.f32 %v878_v21, %v902_v38  ;;  %757 = vst.msk [vmem:[#allocation3 + $0x40] sm:$0xff] %vm747_vm5, %v723_v52  ;;  %v927_v29 = vmax.f32 %v879_v5, %v903_v18  ;;  %v640_v36 = vpop.permute.xlu0 %639  ;;  %v345_v19 = vmax.f32 %v3404_v51, %v3403_v39  ;;  %v3406_v48 = vld [vmem:[#allocation38_spill] sm:$0xff] }
 0x1d4   :  { %997 = vst.msk [vmem:[#allocation4] sm:$0xff] %vm747_vm5, %v973_v23  ;;  %v832_v6 = vmax.f32 %v784_v40, %v808_v53  ;;  %v856_v13 = vld [vmem:[#allocation3 + $0x22] sm:$0xff]  ;;  %v725_v2 = vmax.f32 %v597_v34, %v640_v36 }
 0x1d5   :  { %v785_v30 = vld [vmem:[#allocation3 + $0x28] sm:$0xff]  ;;  %v974_v27 = vmax.f32 %v926_v22, %v950_v56  ;;  %v975_v41 = vmax.f32 %v927_v29, %v951_v43  ;;  %v786_v32 = vld [vmem:[#allocation3 + $0x30] sm:$0xff]  ;;  %v473_v28 = vmax.f32 %v345_v19, %v3405_v55  ;;  %v3409_v29 = vld [vmem:[#allocation39_spill] sm:$0xff] }
 0x1d6   :  { %v880_v10 = vmax.f32 %v832_v6, %v856_v13  ;;  %v904_v26 = vld [vmem:[#allocation3 + $0x23] sm:$0xff]  ;;  %v810_v24 = vld [vmem:[#allocation3 + $0x31] sm:$0xff]  ;;  %759 = vst.msk [vmem:[#allocation3 + $0x50] sm:$0xff] %vm747_vm5, %v725_v2 }
 0x1d7   :  { %v809_v15 = vld [vmem:[#allocation3 + $0x29] sm:$0xff]  ;;  %998 = vst.msk [vmem:[#allocation4 + $0x8] sm:$0xff] %vm747_vm5, %v974_v27  ;;  %999 = vst.msk [vmem:[#allocation4 + $0x10] sm:$0xff] %vm747_vm5, %v975_v41  ;;  %v834_v33 = vmax.f32 %v786_v32, %v810_v24  ;;  %v644_v45 = vpop.permute.xlu0 %643  ;;  %v858_v20 = vld [vmem:[#allocation3 + $0x32] sm:$0xff]  ;;  %v601_v23 = vmax.f32 %v473_v28, %v2497_v37 }
 0x1d8   :  { %v928_v25 = vmax.f32 %v880_v10, %v904_v26  ;;  %v833_v42 = vmax.f32 %v785_v30, %v809_v15  ;;  %v952_v1 = vld [vmem:[#allocation3 + $0x24] sm:$0xff]  ;;  %v727_v50 = vmax.f32 %v599_v58, %v644_v45  ;;  %v906_v46 = vld [vmem:[#allocation3 + $0x33] sm:$0xff] }
 0x1d9   :  { %v857_v11 = vld [vmem:[#allocation3 + $0x2a] sm:$0xff]  ;;  %v882_v17 = vmax.f32 %v834_v33, %v858_v20  ;;  %v954_v37 = vld [vmem:[#allocation3 + $0x34] sm:$0xff]  ;;  %v3412_v33 = vld [vmem:[#allocation40_spill] sm:$0xff] }
 0x1da   :  { %v976_v60 = vmax.f32 %v928_v25, %v952_v1  ;;  %v881_v44 = vmax.f32 %v833_v42, %v857_v11  ;;  %v905_v62 = vld [vmem:[#allocation3 + $0x2b] sm:$0xff]  ;;  %v787_v63 = vld [vmem:[#allocation3 + $0x40] sm:$0xff]  ;;  %761 = vst.msk [vmem:[#allocation3 + $0x60] sm:$0xff] %vm747_vm5, %v727_v50  ;;  %v3410_v56 = vld [vmem:[#allocation23_spill] sm:$0xff] }
 0x1db   :  { %v811_v12 = vld [vmem:[#allocation3 + $0x41] sm:$0xff]  ;;  %v930_v5 = vmax.f32 %v882_v17, %v906_v46  ;;  %v953_v38 = vld [vmem:[#allocation3 + $0x2c] sm:$0xff]  ;;  %v648_v53 = vpop.permute.xlu0 %647  ;;  %v349_v13 = vmax.f32 %v3410_v56, %v3409_v29 }
 0x1dc   :  { %v3407_v49 = vld [vmem:[#allocation21_spill] sm:$0xff]  ;;  %1000 = vst.msk [vmem:[#allocation4 + $0x18] sm:$0xff] %vm747_vm5, %v976_v60  ;;  %v929_v21 = vmax.f32 %v881_v44, %v905_v62  ;;  %v835_v59 = vmax.f32 %v787_v63, %v811_v12  ;;  %v2624_v52 = vld [vmem:[#allocation4] sm:$0xff]  ;;  %v729_v6 = vmax.f32 %v601_v23, %v648_v53  ;;  %v3411_v41 = vld [vmem:[#allocation58_spill] sm:$0xff] }
 0x1dd   :  { %v347_v31 = vmax.f32 %v3407_v49, %v3406_v48  ;;  %v859_v40 = vld [vmem:[#allocation3 + $0x42] sm:$0xff]  ;;  %1069 = vrot.lane.b32.xlu0 %v2624_v52, %s1876_s16  ;;  %v978_v36 = vmax.f32 %v930_v5, %v954_v37  ;;  %v789_v9 = vld [vmem:[#allocation3 + $0x50] sm:$0xff]  ;;  %v477_v26 = vmax.f32 %v349_v13, %v3411_v41  ;;  %v3414_v63 = vld [vmem:[#allocation59_spill] sm:$0xff] }
 0x1de   :  { %v3408_v35 = vld [vmem:[#allocation57_spill] sm:$0xff]  ;;  %v977_v34 = vmax.f32 %v929_v21, %v953_v38  ;;  %v883_v18 = vmax.f32 %v835_v59, %v859_v40  ;;  %v813_v30 = vld [vmem:[#allocation3 + $0x51] sm:$0xff]  ;;  %763 = vst.msk [vmem:[#allocation3 + $0x70] sm:$0xff] %vm747_vm5, %v729_v6  ;;  %v3413_v11 = vld [vmem:[#allocation24_spill] sm:$0xff] }
 0x1df   :  { %v475_v61 = vmax.f32 %v347_v31, %v3408_v35  ;;  %v788_v8 = vld [vmem:[#allocation3 + $0x48] sm:$0xff]  ;;  %v837_v2 = vmax.f32 %v789_v9, %v813_v30  ;;  %1002 = vst.msk [vmem:[#allocation4 + $0x28] sm:$0xff] %vm747_vm5, %v978_v36  ;;  %v861_v39 = vld [vmem:[#allocation3 + $0x52] sm:$0xff]  ;;  %v652_v51 = vpop.permute.xlu0 %651  ;;  %v351_v45 = vmax.f32 %v3413_v11, %v3412_v33  ;;  %v605_v20 = vmax.f32 %v477_v26, %v2511_v47  ;;  %v3417_v29 = vld [vmem:[#allocation60_spill] sm:$0xff] }
 0x1e0   :  { %v907_v22 = vld [vmem:[#allocation3 + $0x43] sm:$0xff]  ;;  %1001 = vst.msk [vmem:[#allocation4 + $0x20] sm:$0xff] %vm747_vm5, %v977_v34  ;;  %v908_v24 = vld [vmem:[#allocation3 + $0x4b] sm:$0xff]  ;;  %v909_v55 = vld [vmem:[#allocation3 + $0x53] sm:$0xff] }
 0x1e1   :  { %v812_v16 = vld [vmem:[#allocation3 + $0x49] sm:$0xff]  ;;  %v603_v43 = vmax.f32 %v475_v61, %v2504_v0  ;;  %v931_v27 = vmax.f32 %v883_v18, %v907_v22  ;;  %v885_v25 = vmax.f32 %v837_v2, %v861_v39  ;;  %v790_v28 = vld [vmem:[#allocation3 + $0x60] sm:$0xff]  ;;  %v479_v12 = vmax.f32 %v351_v45, %v3414_v63  ;;  %v957_v49 = vld [vmem:[#allocation3 + $0x54] sm:$0xff] }
 0x1e2   :  { %v836_v10 = vmax.f32 %v788_v8, %v812_v16  ;;  %v955_v32 = vld [vmem:[#allocation3 + $0x44] sm:$0xff]  ;;  %v2638_v42 = vld [vmem:[#allocation4 + $0x10] sm:$0xf] }
 0x1e3   :  { %v860_v15 = vld [vmem:[#allocation3 + $0x4a] sm:$0xff]  ;;  %v979_v19 = vmax.f32 %v931_v27, %v955_v32  ;;  %v731_v1 = vmax.f32 %v603_v43, %v652_v51  ;;  %v814_v60 = vld [vmem:[#allocation3 + $0x61] sm:$0xff]  ;;  %1073 = vrot.lane.b32.xlu0 %v2638_v42, %s1876_s16  ;;  %v933_v50 = vmax.f32 %v885_v25, %v909_v55  ;;  %v2649_v62 = vld [vmem:[#allocation4 + $0x18] sm:$0xff]  ;;  %v656_v23 = vpop.permute.xlu0 %655  ;;  %v607_v34 = vmax.f32 %v479_v12, %v2518_v3 }
 0x1e4   :  { %v884_v58 = vmax.f32 %v836_v10, %v860_v15  ;;  %v2636_v0 = vld [vmem:[#allocation4 + $0x8] sm:$0xff]  ;;  %v838_v17 = vmax.f32 %v790_v28, %v814_v60  ;;  %v733_v38 = vmax.f32 %v605_v20, %v656_v23  ;;  %v3418_v26 = vld [vmem:[#allocation42_spill] sm:$0xff] }
 0x1e5   :  { %1071 = vrot.lane.b32.xlu1 %v2636_v0, %s1876_s16  ;;  %1003 = vst.msk [vmem:[#allocation4 + $0x30] sm:$0xff] %vm747_vm5, %v979_v19  ;;  %765 = vst.msk [vmem:[#allocation3 + $0x80] sm:$0xff] %vm747_vm5, %v731_v1  ;;  %v956_v48 = vld [vmem:[#allocation3 + $0x4c] sm:$0xff]  ;;  %v862_v31 = vld [vmem:[#allocation3 + $0x62] sm:$0xff]  ;;  %v981_v59 = vmax.f32 %v933_v50, %v957_v49 }
 0x1e6   :  { %v932_v44 = vmax.f32 %v884_v58, %v908_v24  ;;  %v791_v46 = vld [vmem:[#allocation3 + $0x68] sm:$0xff]  ;;  %v886_v5 = vmax.f32 %v838_v17, %v862_v31  ;;  %v792_v61 = vld [vmem:[#allocation3 + $0x70] sm:$0xff]  ;;  %767 = vst.msk [vmem:[#allocation3 + $0x90] sm:$0xff] %vm747_vm5, %v733_v38  ;;  %v3422_v49 = vld [vmem:[#allocation27_spill] sm:$0xff] }
 0x1e7   :  { %v910_v47 = vld [vmem:[#allocation3 + $0x63] sm:$0xff]  ;;  %v816_v37 = vld [vmem:[#allocation3 + $0x71] sm:$0xff]  ;;  %1005 = vst.msk [vmem:[#allocation4 + $0x40] sm:$0xff] %vm747_vm5, %v981_v59  ;;  %v660_v16 = vpop.permute.xlu0 %659 }
 0x1e8   :  { %v980_v21 = vmax.f32 %v932_v44, %v956_v48  ;;  %v3415_v40 = vld [vmem:[#allocation41_spill] sm:$0xff]  ;;  %v934_v18 = vmax.f32 %v886_v5, %v910_v47  ;;  %v840_v6 = vmax.f32 %v792_v61, %v816_v37  ;;  %v864_v9 = vld [vmem:[#allocation3 + $0x72] sm:$0xff]  ;;  %v2661_v3 = vld [vmem:[#allocation4 + $0x20] sm:$0xff]  ;;  %v735_v41 = vmax.f32 %v607_v34, %v660_v16 }
 0x1e9   :  { %v3416_v53 = vld [vmem:[#allocation25_spill] sm:$0xff]  ;;  %1075 = vrot.lane.b32.xlu1 %v2649_v62, %s1876_s16  ;;  %v3419_v32 = vld [vmem:[#allocation26_spill] sm:$0xff]  ;;  %1077 = vrot.lane.b32.xlu0 %v2661_v3, %s1876_s16  ;;  %v3421_v48 = vld [vmem:[#allocation43_spill] sm:$0xff] }
 0x1ea   :  { %v353_v35 = vmax.f32 %v3416_v53, %v3415_v40  ;;  %v815_v8 = vld [vmem:[#allocation3 + $0x69] sm:$0xff]  ;;  %1004 = vst.msk [vmem:[#allocation4 + $0x38] sm:$0xff] %vm747_vm5, %v980_v21  ;;  %v888_v27 = vmax.f32 %v840_v6, %v864_v9  ;;  %v355_v15 = vmax.f32 %v3419_v32, %v3418_v26  ;;  %v912_v39 = vld [vmem:[#allocation3 + $0x73] sm:$0xff]  ;;  %769 = vst.msk [vmem:[#allocation3 + $0xa0] sm:$0xff] %vm747_vm5, %v735_v41 }
 0x1eb   :  { %v839_v22 = vmax.f32 %v791_v46, %v815_v8  ;;  %v958_v13 = vld [vmem:[#allocation3 + $0x64] sm:$0xff]  ;;  %v959_v55 = vld [vmem:[#allocation3 + $0x6c] sm:$0xff]  ;;  %v960_v28 = vld [vmem:[#allocation3 + $0x74] sm:$0xff]  ;;  %v664_v20 = vpop.permute.xlu0 %663  ;;  %v357_v31 = vmax.f32 %v3422_v49, %v3421_v48 }
 0x1ec   :  { %v481_v56 = vmax.f32 %v353_v35, %v3417_v29  ;;  %v863_v36 = vld [vmem:[#allocation3 + $0x6a] sm:$0xff]  ;;  %v982_v30 = vmax.f32 %v934_v18, %v958_v13  ;;  %v793_v51 = vld [vmem:[#allocation3 + $0x80] sm:$0xff]  ;;  %v936_v24 = vmax.f32 %v888_v27, %v912_v39 }
 0x1ed   :  { %v887_v43 = vmax.f32 %v839_v22, %v863_v36  ;;  %v911_v10 = vld [vmem:[#allocation3 + $0x6b] sm:$0xff]  ;;  %v817_v19 = vld [vmem:[#allocation3 + $0x81] sm:$0xff]  ;;  %v915_v16 = vld [vmem:[#allocation3 + $0x93] sm:$0xff] }
 0x1ee   :  { %v2663_v2 = vld [vmem:[#allocation4 + $0x28] sm:$0xf]  ;;  %v609_v58 = vmax.f32 %v481_v56, %v2525_v14  ;;  %1006 = vst.msk [vmem:[#allocation4 + $0x48] sm:$0xff] %vm747_vm5, %v982_v30  ;;  %v841_v1 = vmax.f32 %v793_v51, %v817_v19  ;;  %v2674_v33 = vld [vmem:[#allocation4 + $0x30] sm:$0xff]  ;;  %v984_v17 = vmax.f32 %v936_v24, %v960_v28  ;;  %v2688_v29 = vld [vmem:[#allocation4 + $0x40] sm:$0xf] }
 0x1ef   :  { %1079 = vrot.lane.b32.xlu1 %v2663_v2, %s1876_s16  ;;  %v935_v25 = vmax.f32 %v887_v43, %v911_v10  ;;  %v3420_v11 = vld [vmem:[#allocation61_spill] sm:$0xff]  ;;  %v795_v23 = vld [vmem:[#allocation3 + $0x90] sm:$0xff]  ;;  %1081 = vrot.lane.b32.xlu0 %v2674_v33, %s1876_s16  ;;  %v668_v37 = vpop.permute.xlu0 %667  ;;  %v1822_v13 = vld [vmem:[#allocation2 + $0xe0] sm:$0xff] }
 0x1f0   :  { %v483_v45 = vmax.f32 %v355_v15, %v3420_v11  ;;  %v865_v60 = vld [vmem:[#allocation3 + $0x82] sm:$0xff]  ;;  %v737_v12 = vmax.f32 %v609_v58, %v664_v20  ;;  %v819_v21 = vld [vmem:[#allocation3 + $0x91] sm:$0xff]  ;;  %1008 = vst.msk [vmem:[#allocation4 + $0x58] sm:$0xff] %vm747_vm5, %v984_v17 }
 0x1f1   :  { %v794_v44 = vld [vmem:[#allocation3 + $0x88] sm:$0xff]  ;;  %v983_v50 = vmax.f32 %v935_v25, %v959_v55  ;;  %v889_v63 = vmax.f32 %v841_v1, %v865_v60  ;;  %v843_v38 = vmax.f32 %v795_v23, %v819_v21  ;;  %v3423_v40 = vld [vmem:[#allocation62_spill] sm:$0xff]  ;;  %v3424_v36 = vld [vmem:[#allocation44_spill] sm:$0xff] }
 0x1f2   :  { %v913_v14 = vld [vmem:[#allocation3 + $0x83] sm:$0xff]  ;;  %v611_v59 = vmax.f32 %v483_v45, %v2532_v4  ;;  %771 = vst.msk [vmem:[#allocation3 + $0xb0] sm:$0xff] %vm747_vm5, %v737_v12  ;;  %v485_v53 = vmax.f32 %v357_v31, %v3423_v40  ;;  %v867_v8 = vld [vmem:[#allocation3 + $0x92] sm:$0xff]  ;;  %v359_v9 = vmax.f32 %v1822_v13, %v3424_v36 }
 0x1f3   :  { %v818_v46 = vld [vmem:[#allocation3 + $0x89] sm:$0xff]  ;;  %1007 = vst.msk [vmem:[#allocation4 + $0x50] sm:$0xff] %vm747_vm5, %v983_v50  ;;  %v937_v5 = vmax.f32 %v889_v63, %v913_v14  ;;  %v891_v22 = vmax.f32 %v843_v38, %v867_v8  ;;  %v2686_v4 = vld [vmem:[#allocation4 + $0x38] sm:$0xff]  ;;  %v796_v30 = vld [vmem:[#allocation3 + $0xa0] sm:$0xff]  ;;  %1085 = vrot.lane.b32.xlu0 %v2688_v29, %s1876_s16  ;;  %v672_v25 = vpop.permute.xlu0 %671 }
 0x1f4   :  { %v842_v47 = vmax.f32 %v794_v44, %v818_v46  ;;  %v961_v35 = vld [vmem:[#allocation3 + $0x84] sm:$0xff]  ;;  %v739_v56 = vmax.f32 %v611_v59, %v668_v37  ;;  %1083 = vrot.lane.b32.xlu1 %v2686_v4, %s1876_s16  ;;  %v613_v27 = vmax.f32 %v485_v53, %v2539_v7  ;;  %v3425_v15 = vld [vmem:[#allocation63_spill] sm:$0xff]  ;;  %v962_v51 = vld [vmem:[#allocation3 + $0x8c] sm:$0xff] }
 0x1f5   :  { %v866_v61 = vld [vmem:[#allocation3 + $0x8a] sm:$0xff]  ;;  %v985_v34 = vmax.f32 %v937_v5, %v961_v35  ;;  %v820_v43 = vld [vmem:[#allocation3 + $0xa1] sm:$0xff]  ;;  %v939_v41 = vmax.f32 %v891_v22, %v915_v16  ;;  %v487_v39 = vmax.f32 %v359_v9, %v3425_v15  ;;  %v963_v19 = vld [vmem:[#allocation3 + $0x94] sm:$0xff] }
 0x1f6   :  { %v890_v18 = vmax.f32 %v842_v47, %v866_v61  ;;  %v914_v6 = vld [vmem:[#allocation3 + $0x8b] sm:$0xff]  ;;  %v844_v26 = vmax.f32 %v796_v30, %v820_v43  ;;  %773 = vst.msk [vmem:[#allocation3 + $0xc0] sm:$0xff] %vm747_vm5, %v739_v56  ;;  %v868_v58 = vld [vmem:[#allocation3 + $0xa2] sm:$0xff]  ;;  %v741_v55 = vmax.f32 %v613_v27, %v672_v25 }
 0x1f7   :  { %1009 = vst.msk [vmem:[#allocation4 + $0x60] sm:$0xff] %vm747_vm5, %v985_v34  ;;  %v2698_v32 = vld [vmem:[#allocation4 + $0x48] sm:$0xff]  ;;  %v987_v11 = vmax.f32 %v939_v41, %v963_v19  ;;  %v1823_v28 = vld [vmem:[#allocation2 + $0xf0] sm:$0xff]  ;;  %v615_v63 = vmax.f32 %v487_v39, %v2546_v57  ;;  %v3427_v49 = vld [vmem:[#allocation64_spill] sm:$0xff]  ;;  %v676_v59 = vpop.permute.xlu0 %675 }
 0x1f8   :  { %v938_v10 = vmax.f32 %v890_v18, %v914_v6  ;;  %v797_v24 = vld [vmem:[#allocation3 + $0xa8] sm:$0xff]  ;;  %v892_v45 = vmax.f32 %v844_v26, %v868_v58  ;;  %1087 = vrot.lane.b32.xlu1 %v2698_v32, %s1876_s16  ;;  %775 = vst.msk [vmem:[#allocation3 + $0xd0] sm:$0xff] %vm747_vm5, %v741_v55  ;;  %v2711_v53 = vld [vmem:[#allocation4 + $0x58] sm:$0xf] }
 0x1f9   :  { %v916_v7 = vld [vmem:[#allocation3 + $0xa3] sm:$0xff]  ;;  %v798_v44 = vld [vmem:[#allocation3 + $0xb0] sm:$0xff]  ;;  %1011 = vst.msk [vmem:[#allocation4 + $0x70] sm:$0xff] %vm747_vm5, %v987_v11  ;;  %v743_v35 = vmax.f32 %v615_v63, %v676_v59 }
 0x1fa   :  { %v986_v1 = vmax.f32 %v938_v10, %v962_v51  ;;  %v3426_v60 = vld [vmem:[#allocation45_spill] sm:$0xff]  ;;  %v822_v17 = vld [vmem:[#allocation3 + $0xb1] sm:$0xff]  ;;  %v940_v14 = vmax.f32 %v892_v45, %v916_v7 }
 0x1fb   :  { %v361_v20 = vmax.f32 %v1823_v28, %v3426_v60  ;;  %v821_v50 = vld [vmem:[#allocation3 + $0xa9] sm:$0xff]  ;;  %v846_v48 = vmax.f32 %v798_v44, %v822_v17  ;;  %v870_v21 = vld [vmem:[#allocation3 + $0xb2] sm:$0xff]  ;;  %777 = vst.msk [vmem:[#allocation3 + $0xe0] sm:$0xff] %vm747_vm5, %v743_v35  ;;  %v680_v16 = vpop.permute.xlu0 %679 }
 0x1fc   :  { %1010 = vst.msk [vmem:[#allocation4 + $0x68] sm:$0xff] %vm747_vm5, %v986_v1  ;;  %v845_v12 = vmax.f32 %v797_v24, %v821_v50  ;;  %v964_v23 = vld [vmem:[#allocation3 + $0xa4] sm:$0xff]  ;;  %v2709_v57 = vld [vmem:[#allocation4 + $0x50] sm:$0xff]  ;;  %1091 = vrot.lane.b32.xlu1 %v2711_v53, %s1876_s16 }
 0x1fd   :  { %v489_v31 = vmax.f32 %v361_v20, %v3427_v49  ;;  %v869_v46 = vld [vmem:[#allocation3 + $0xaa] sm:$0xff]  ;;  %v988_v5 = vmax.f32 %v940_v14, %v964_v23  ;;  %v894_v38 = vmax.f32 %v846_v48, %v870_v21  ;;  %v918_v61 = vld [vmem:[#allocation3 + $0xb3] sm:$0xff]  ;;  %v799_v8 = vld [vmem:[#allocation3 + $0xc0] sm:$0xff]  ;;  %1089 = vrot.lane.b32.xlu0 %v2709_v57, %s1876_s16 }
 0x1fe   :  { %v893_v47 = vmax.f32 %v845_v12, %v869_v46  ;;  %v917_v40 = vld [vmem:[#allocation3 + $0xab] sm:$0xff]  ;;  %v823_v37 = vld [vmem:[#allocation3 + $0xc1] sm:$0xff]  ;;  %v966_v36 = vld [vmem:[#allocation3 + $0xb4] sm:$0xff] }
 0x1ff   :  { %v617_v34 = vmax.f32 %v489_v31, %v2555_v54  ;;  %1012 = vst.msk [vmem:[#allocation4 + $0x78] sm:$0xff] %vm747_vm5, %v988_v5  ;;  %v942_v22 = vmax.f32 %v894_v38, %v918_v61  ;;  %v847_v6 = vmax.f32 %v799_v8, %v823_v37  ;;  %v2720_v56 = vld [vmem:[#allocation4 + $0x60] sm:$0xff]  ;;  %v965_v13 = vld [vmem:[#allocation3 + $0xac] sm:$0xff]  ;;  %v969_v49 = vld [vmem:[#allocation3 + $0xd4] sm:$0xff] }
 0x200   :  { %v941_v18 = vmax.f32 %v893_v47, %v917_v40  ;;  %v871_v9 = vld [vmem:[#allocation3 + $0xc2] sm:$0xff]  ;;  %v801_v54 = vld [vmem:[#allocation3 + $0xd0] sm:$0xff] }
 0x201   :  { %v800_v30 = vld [vmem:[#allocation3 + $0xc8] sm:$0xff]  ;;  %v990_v27 = vmax.f32 %v942_v22, %v966_v36  ;;  %v895_v10 = vmax.f32 %v847_v6, %v871_v9  ;;  %v745_v26 = vmax.f32 %v617_v34, %v680_v16  ;;  %v825_v39 = vld [vmem:[#allocation3 + $0xd1] sm:$0xff]  ;;  %1093 = vrot.lane.b32.xlu0 %v2720_v56, %s1876_s16 }
 0x202   :  { %v989_v43 = vmax.f32 %v941_v18, %v965_v13  ;;  %v919_v41 = vld [vmem:[#allocation3 + $0xc3] sm:$0xff]  ;;  %v849_v58 = vmax.f32 %v801_v54, %v825_v39  ;;  %v873_v1 = vld [vmem:[#allocation3 + $0xd2] sm:$0xff] }
 0x203   :  { %v824_v15 = vld [vmem:[#allocation3 + $0xc9] sm:$0xff]  ;;  %1014 = vst.msk [vmem:[#allocation4 + $0x88] sm:$0xff] %vm747_vm5, %v990_v27  ;;  %v943_v51 = vmax.f32 %v895_v10, %v919_v41  ;;  %779 = vst.msk [vmem:[#allocation3 + $0xf0] sm:$0xff] %vm747_vm5, %v745_v26  ;;  %v921_v20 = vld [vmem:[#allocation3 + $0xd3] sm:$0xff] }
 0x204   :  { %1013 = vst.msk [vmem:[#allocation4 + $0x80] sm:$0xff] %vm747_vm5, %v989_v43  ;;  %v848_v19 = vmax.f32 %v800_v30, %v824_v15  ;;  %v967_v25 = vld [vmem:[#allocation3 + $0xc4] sm:$0xff]  ;;  %v897_v7 = vmax.f32 %v849_v58, %v873_v1  ;;  %v2729_v60 = vld [vmem:[#allocation4 + $0x70] sm:$0xf] }
 0x205   :  { %v872_v24 = vld [vmem:[#allocation3 + $0xca] sm:$0xff]  ;;  %v991_v11 = vmax.f32 %v943_v51, %v967_v25  ;;  %v802_v44 = vld [vmem:[#allocation3 + $0xe0] sm:$0xff]  ;;  %1097 = vrot.lane.b32.xlu0 %v2729_v60, %s1876_s16 }
 0x206   :  { %v896_v45 = vmax.f32 %v848_v19, %v872_v24  ;;  %v920_v55 = vld [vmem:[#allocation3 + $0xcb] sm:$0xff]  ;;  %v826_v50 = vld [vmem:[#allocation3 + $0xe1] sm:$0xff]  ;;  %v945_v63 = vmax.f32 %v897_v7, %v921_v20  ;;  %v2736_v12 = vld [vmem:[#allocation4 + $0x78] sm:$0xff] }
 0x207   :  { %v2727_v28 = vld [vmem:[#allocation4 + $0x68] sm:$0xff]  ;;  %1015 = vst.msk [vmem:[#allocation4 + $0x90] sm:$0xff] %vm747_vm5, %v991_v11  ;;  %v850_v14 = vmax.f32 %v802_v44, %v826_v50  ;;  %v2785_v11 = vld [vmem:[#allocation4 + $0x14] sm:$0xf]  ;;  %v2803_v44 = vld [vmem:[#allocation4 + $0x3c] sm:$0xff] }
 0x208   :  { %1095 = vrot.lane.b32.xlu1 %v2727_v28, %s1876_s16  ;;  %v944_v17 = vmax.f32 %v896_v45, %v920_v55  ;;  %v968_v48 = vld [vmem:[#allocation3 + $0xcc] sm:$0xff]  ;;  %v874_v31 = vld [vmem:[#allocation3 + $0xe2] sm:$0xff]  ;;  %v993_v21 = vmax.f32 %v945_v63, %v969_v49  ;;  %v2801_v20 = vld [vmem:[#allocation4 + $0x34] sm:$0xff] }
 0x209   :  { %v803_v23 = vld [vmem:[#allocation3 + $0xe8] sm:$0xff]  ;;  %v898_v59 = vmax.f32 %v850_v14, %v874_v31  ;;  %v2787_v45 = vld [vmem:[#allocation4 + $0x1c] sm:$0xff]  ;;  %v2809_v50 = vld [vmem:[#allocation4 + $0x44] sm:$0xf] }
 0x20a   :  { %v992_v46 = vmax.f32 %v944_v17, %v968_v48  ;;  %v922_v5 = vld [vmem:[#allocation3 + $0xe3] sm:$0xff]  ;;  %v804_v47 = vld [vmem:[#allocation3 + $0xf0] sm:$0xff]  ;;  %1017 = vst.msk [vmem:[#allocation4 + $0xa0] sm:$0xff] %vm747_vm5, %v993_v21  ;;  %v2795_v55 = vld [vmem:[#allocation4 + $0x2c] sm:$0xf] }
 0x20b   :  { %v827_v38 = vld [vmem:[#allocation3 + $0xe9] sm:$0xff]  ;;  %v828_v40 = vld [vmem:[#allocation3 + $0xf1] sm:$0xff]  ;;  %v946_v35 = vmax.f32 %v898_v59, %v922_v5  ;;  %v2742_v36 = vld [vmem:[#allocation4 + $0x80] sm:$0xff] }
 0x20c   :  { %1099 = vrot.lane.b32.xlu1 %v2736_v12, %s1876_s16  ;;  %1016 = vst.msk [vmem:[#allocation4 + $0x98] sm:$0xff] %vm747_vm5, %v992_v46  ;;  %v851_v61 = vmax.f32 %v803_v23, %v827_v38  ;;  %v852_v8 = vmax.f32 %v804_v47, %v828_v40  ;;  %v970_v37 = vld [vmem:[#allocation3 + $0xe4] sm:$0xff]  ;;  %v876_v18 = vld [vmem:[#allocation3 + $0xf2] sm:$0xff]  ;;  %3428 = vst [vmem:[#allocation35_spill] sm:$0xff] %v2742_v36  ;;  %1101 = vrot.lane.b32.xlu0 %v2742_v36, %s1876_s16 }
 0x20d   :  { %v875_v34 = vld [vmem:[#allocation3 + $0xea] sm:$0xff]  ;;  %v994_v22 = vmax.f32 %v946_v35, %v970_v37  ;;  %v924_v30 = vld [vmem:[#allocation3 + $0xf3] sm:$0xff]  ;;  %v2819_v14 = vld [vmem:[#allocation4 + $0x5c] sm:$0xf] }
 0x20e   :  { %v899_v6 = vmax.f32 %v851_v61, %v875_v34  ;;  %v900_v13 = vmax.f32 %v852_v8, %v876_v18  ;;  %v2744_v9 = vld [vmem:[#allocation4 + $0x88] sm:$0xf]  ;;  %v2751_v10 = vld [vmem:[#allocation4 + $0x90] sm:$0xff]  ;;  %v2835_v23 = vld [vmem:[#allocation4 + $0x7c] sm:$0xff] }
 0x20f   :  { %v923_v16 = vld [vmem:[#allocation3 + $0xeb] sm:$0xff]  ;;  %1018 = vst.msk [vmem:[#allocation4 + $0xa8] sm:$0xff] %vm747_vm5, %v994_v22  ;;  %3429 = vst [vmem:[#allocation20_spill] sm:$0xff] %v2751_v10  ;;  %v972_v26 = vld [vmem:[#allocation3 + $0xf4] sm:$0xff] }
 0x210   :  { %1103 = vrot.lane.b32.xlu1 %v2744_v9, %s1876_s16  ;;  %v947_v43 = vmax.f32 %v899_v6, %v923_v16  ;;  %v948_v27 = vmax.f32 %v900_v13, %v924_v30  ;;  %v971_v41 = vld [vmem:[#allocation3 + $0xec] sm:$0xff]  ;;  %1105 = vrot.lane.b32.xlu0 %v2751_v10, %s1876_s16  ;;  %v2777_v24 = vld [vmem:[#allocation4 + $0x4] sm:$0xff]  ;;  %v2817_v63 = vld [vmem:[#allocation4 + $0x54] sm:$0xff] }
 0x211   :  { %v2761_v51 = vld [vmem:[#allocation4 + $0xa0] sm:$0xf]  ;;  %v2779_v1 = vld [vmem:[#allocation4 + $0xc] sm:$0xff]  ;;  %v2793_v7 = vld [vmem:[#allocation4 + $0x24] sm:$0xff] }
 0x212   :  { %v995_v54 = vmax.f32 %v947_v43, %v971_v41  ;;  %v996_v15 = vmax.f32 %v948_v27, %v972_v26  ;;  %3431 = vst [vmem:[#allocation47_spill] sm:$0xff] %v2761_v51  ;;  %v2811_v17 = vld [vmem:[#allocation4 + $0x4c] sm:$0xff]  ;;  %v2825_v48 = vld [vmem:[#allocation4 + $0x64] sm:$0xff]  ;;  %v2833_v31 = vld [vmem:[#allocation4 + $0x74] sm:$0xf] }
 0x213   :  { %v2755_v39 = vld [vmem:[#allocation4 + $0x98] sm:$0xff]  ;;  %v2827_v49 = vld [vmem:[#allocation4 + $0x6c] sm:$0xff]  ;;  %v2841_v46 = vld [vmem:[#allocation4 + $0x84] sm:$0xff] }
 0x214   :  { %3430 = vst [vmem:[#allocation46_spill] sm:$0xff] %v2755_v39  ;;  %1019 = vst.msk [vmem:[#allocation4 + $0xb0] sm:$0xff] %vm747_vm5, %v995_v54  ;;  %1107 = vrot.lane.b32.xlu1 %v2755_v39, %s1876_s16  ;;  %1109 = vrot.lane.b32.xlu0 %v2761_v51, %s1876_s16  ;;  %v2843_v21 = vld [vmem:[#allocation4 + $0x8c] sm:$0xf]  ;;  %v2849_v59 = vld [vmem:[#allocation4 + $0x94] sm:$0xff] }
 0x215   :  { %1020 = vst.msk [vmem:[#allocation4 + $0xb8] sm:$0xff] %vm747_vm5, %v996_v15  ;;  %3435 = vst [vmem:[#allocation14_spill] sm:$0xff] %v2841_v46  ;;  %v2851_v5 = vld [vmem:[#allocation4 + $0x9c] sm:$0xff]  ;;  %v2857_v47 = vld [vmem:[#allocation4 + $0xa4] sm:$0xf] }
 0x216   :  { %v2765_v19 = vld [vmem:[#allocation4 + $0xa8] sm:$0xff]  ;;  %3436 = vst [vmem:[#allocation65_spill] sm:$0xff] %v2843_v21  ;;  %3437 = vst [vmem:[#allocation66_spill] sm:$0xff] %v2849_v59 }
 0x217   :  { %3432 = vst [vmem:[#allocation28_spill] sm:$0xff] %v2765_v19  ;;  %3438 = vst [vmem:[#allocation48_spill] sm:$0xff] %v2851_v5 }
 0x218   :  { %1111 = vrot.lane.b32.xlu1 %v2765_v19, %s1876_s16  ;;  %3439 = vst [vmem:[#allocation49_spill] sm:$0xff] %v2857_v47 }
 0x21b   :  { %v2769_v58 = vld [vmem:[#allocation4 + $0xb0] sm:$0xff] }
 0x21c   :  { %3433 = vst [vmem:[#allocation12_spill] sm:$0xff] %v2769_v58  ;;  %v2771_v25 = vld [vmem:[#allocation4 + $0xb8] sm:$0xf]  ;;  %1113 = vrot.lane.b32.xlu0 %v2769_v58, %s1876_s16  ;;  %v2859_v38 = vld [vmem:[#allocation4 + $0xac] sm:$0xff]  ;;  %v2867_v35 = vld [vmem:[#allocation4 + $0xbc] sm:$0xf] }
 0x21d   :  { %3434 = vst [vmem:[#allocation30_spill] sm:$0xff] %v2771_v25  ;;  %1115 = vrot.lane.b32.xlu1 %v2771_v25, %s1876_s16  ;;  %3440 = vst [vmem:[#allocation31_spill] sm:$0xff] %v2859_v38  ;;  %v2865_v40 = vld [vmem:[#allocation4 + $0xb4] sm:$0xff] }
 0x21e   :  { %3441 = vst [vmem:[#allocation15_spill] sm:$0xff] %v2865_v40  ;;  %3442 = vst [vmem:[#allocation37_spill] sm:$0xff] %v2867_v35 }
 0x220   :  { %1213 = vrot.lane.b32.xlu0 %v2777_v24, %s1876_s16 }
 0x221   :  { %1215 = vrot.lane.b32.xlu1 %v2779_v1, %s1876_s16 }
 0x224   :  { %1217 = vrot.lane.b32.xlu0 %v2785_v11, %s1876_s16 }
 0x225   :  { %1219 = vrot.lane.b32.xlu1 %v2787_v45, %s1876_s16 }
 0x228   :  { %1221 = vrot.lane.b32.xlu0 %v2793_v7, %s1876_s16 }
 0x229   :  { %1223 = vrot.lane.b32.xlu1 %v2795_v55, %s1876_s16 }
 0x22c   :  { %1225 = vrot.lane.b32.xlu0 %v2801_v20, %s1876_s16 }
 0x22d   :  { %1227 = vrot.lane.b32.xlu1 %v2803_v44, %s1876_s16 }
 0x230   :  { %1229 = vrot.lane.b32.xlu0 %v2809_v50, %s1876_s16 }
 0x231   :  { %1231 = vrot.lane.b32.xlu1 %v2811_v17, %s1876_s16 }
 0x234   :  { %1233 = vrot.lane.b32.xlu0 %v2817_v63, %s1876_s16 }
 0x235   :  { %1235 = vrot.lane.b32.xlu1 %v2819_v14, %s1876_s16 }
 0x238   :  { %1237 = vrot.lane.b32.xlu0 %v2825_v48, %s1876_s16 }
 0x239   :  { %1239 = vrot.lane.b32.xlu1 %v2827_v49, %s1876_s16 }
 0x23c   :  { %1241 = vrot.lane.b32.xlu0 %v2833_v31, %s1876_s16 }
 0x23d   :  { %1243 = vrot.lane.b32.xlu1 %v2835_v23, %s1876_s16 }
 0x240   :  { %1245 = vrot.lane.b32.xlu0 %v2841_v46, %s1876_s16 }
 0x241   :  { %1247 = vrot.lane.b32.xlu1 %v2843_v21, %s1876_s16 }
 0x244   :  { %1249 = vrot.lane.b32.xlu0 %v2849_v59, %s1876_s16 }
 0x245   :  { %1251 = vrot.lane.b32.xlu1 %v2851_v5, %s1876_s16 }
 0x248   :  { %1253 = vrot.lane.b32.xlu0 %v2857_v47, %s1876_s16 }
 0x249   :  { %1255 = vrot.lane.b32.xlu1 %v2859_v38, %s1876_s16 }
 0x24c   :  { %1257 = vrot.lane.b32.xlu0 %v2865_v40, %s1876_s16 }
 0x24d   :  { %1259 = vrot.lane.b32.xlu1 %v2867_v35, %s1876_s16 }
 0x24f   :  { %v1070_v61 = vpop.permute.xlu0 %1069 }
 0x250   :  { %v1141_v39 = vmax.f32 %v2624_v52, %v1070_v61 }
 0x255   :  { %v1074_v37 = vpop.permute.xlu0 %1073 }
 0x257   :  { %v1072_v8 = vpop.permute.xlu1 %1071 }
 0x258   :  { %v1142_v10 = vmax.f32 %v2636_v0, %v1072_v8 }
 0x25b   :  { %v1076_v34 = vpop.permute.xlu1 %1075  ;;  %v1078_v18 = vpop.permute.xlu0 %1077 }
 0x261   :  { %v1080_v22 = vpop.permute.xlu1 %1079  ;;  %v1082_v6 = vpop.permute.xlu0 %1081 }
 0x265   :  { %v2873_v16 = vpop.permute.xlu0 %1085 }
 0x266   :  { %v1084_v13 = vpop.permute.xlu1 %1083 }
 0x26a   :  { %v2875_v30 = vpop.permute.xlu1 %1087 }
 0x26e   :  { %v2879_v27 = vpop.permute.xlu1 %1091 }
 0x26f   :  { %v2877_v43 = vpop.permute.xlu0 %1089 }
 0x273   :  { %v2881_v41 = vpop.permute.xlu0 %1093 }
 0x277   :  { %v2885_v54 = vpop.permute.xlu0 %1097 }
 0x27a   :  { %v2883_v26 = vpop.permute.xlu1 %1095 }
 0x27e   :  { %v2887_v15 = vpop.permute.xlu1 %1099  ;;  %v2889_v40 = vpop.permute.xlu0 %1101 }
 0x282   :  { %v2891_v35 = vpop.permute.xlu1 %1103  ;;  %v2893_v58 = vpop.permute.xlu0 %1105 }
 0x283   :  { %3443 = vst [vmem:[#allocation22_spill] sm:$0xff] %v2893_v58 }
 0x286   :  { %v2895_v25 = vpop.permute.xlu1 %1107  ;;  %v2897_v47 = vpop.permute.xlu0 %1109 }
 0x287   :  { %3444 = vst [vmem:[#allocation67_spill] sm:$0xff] %v2895_v25  ;;  %3445 = vst [vmem:[#allocation68_spill] sm:$0xff] %v2897_v47 }
 0x28a   :  { %v2899_v38 = vpop.permute.xlu1 %1111 }
 0x28b   :  { %3446 = vst [vmem:[#allocation50_spill] sm:$0xff] %v2899_v38  ;;  %v1143_v38 = vmax.f32 %v2638_v42, %v1074_v37 }
 0x28e   :  { %v2903_v51 = vpop.permute.xlu0 %1113 }
 0x28f   :  { %v2901_v19 = vpop.permute.xlu1 %1115 }
 0x290   :  { %3447 = vst [vmem:[#allocation51_spill] sm:$0xff] %v2901_v19  ;;  %v1144_v19 = vmax.f32 %v2649_v62, %v1076_v34 }
 0x292   :  { %v1214_v5 = vpop.permute.xlu0 %1213 }
 0x293   :  { %v1216_v59 = vpop.permute.xlu1 %1215  ;;  %v1285_v58 = vmax.f32 %v2777_v24, %v1214_v5 }
 0x294   :  { %v1286_v46 = vmax.f32 %v2779_v1, %v1216_v59 }
 0x295   :  { %v1309_v21 = vmax.f32 %v1141_v39, %v1285_v58  ;;  %v1146_v39 = vmax.f32 %v2663_v2, %v1080_v22  ;;  %v1145_v58 = vmax.f32 %v2661_v3, %v1078_v18  ;;  %v1148_v3 = vmax.f32 %v2686_v4, %v1084_v13 }
 0x296   :  { %v1310_v25 = vmax.f32 %v1142_v10, %v1286_v46  ;;  %v1218_v36 = vpop.permute.xlu0 %1217  ;;  %v1149_v4 = vmax.f32 %v2688_v29, %v2873_v16  ;;  %v1150_v18 = vmax.f32 %v2698_v32, %v2875_v30  ;;  %v1152_v29 = vmax.f32 %v2711_v53, %v2879_v27 }
 0x297   :  { %v1220_v47 = vpop.permute.xlu1 %1219  ;;  %1334 = vst.msk [vmem:[#allocation5] sm:$0xff] %vm1333_vm7, %v1309_v21  ;;  %v1287_v0 = vmax.f32 %v2785_v11, %v1218_v36  ;;  %v1147_v36 = vmax.f32 %v2674_v33, %v1082_v6  ;;  %v1151_v32 = vmax.f32 %v2709_v57, %v2877_v43  ;;  %v1154_v43 = vmax.f32 %v2727_v28, %v2883_v26 }
 0x298   :  { %1335 = vst.msk [vmem:[#allocation5 + $0x8] sm:$0xff] %vm1333_vm7, %v1310_v25  ;;  %v1288_v52 = vmax.f32 %v2787_v45, %v1220_v47  ;;  %v1155_v28 = vmax.f32 %v2729_v60, %v2885_v54  ;;  %v1156_v26 = vmax.f32 %v2736_v12, %v2887_v15  ;;  %v1158_v60 = vmax.f32 %v2744_v9, %v2891_v35  ;;  %v3448_v12 = vld [vmem:[#allocation35_spill] sm:$0xff] }
 0x299   :  { %v1311_v5 = vmax.f32 %v1143_v38, %v1287_v0  ;;  %v1157_v54 = vmax.f32 %v3448_v12, %v2889_v40 }
 0x29a   :  { %v1312_v59 = vmax.f32 %v1144_v19, %v1288_v52  ;;  %v1222_v10 = vpop.permute.xlu0 %1221 }
 0x29b   :  { %v1224_v61 = vpop.permute.xlu1 %1223  ;;  %1337 = vst.msk [vmem:[#allocation5 + $0x10] sm:$0xf] %vm1336_vm8, %v1311_v5  ;;  %v1289_v62 = vmax.f32 %v2793_v7, %v1222_v10  ;;  %v1153_v10 = vmax.f32 %v2720_v56, %v2881_v41 }
 0x29c   :  { %1338 = vst.msk [vmem:[#allocation5 + $0x18] sm:$0xff] %vm1333_vm7, %v1312_v59  ;;  %v1290_v42 = vmax.f32 %v2795_v55, %v1224_v61 }
 0x29d   :  { %v1313_v46 = vmax.f32 %v1145_v58, %v1289_v62 }
 0x29e   :  { %v1314_v25 = vmax.f32 %v1146_v39, %v1290_v42  ;;  %v1226_v11 = vpop.permute.xlu0 %1225  ;;  %v2924_v47 = vld [vmem:[#allocation5] sm:$0xff] }
 0x29f   :  { %v1228_v19 = vpop.permute.xlu1 %1227  ;;  %v2922_v21 = vld [vmem:[#allocation5 + $0x8] sm:$0xff]  ;;  %1339 = vst.msk [vmem:[#allocation5 + $0x20] sm:$0xff] %vm1333_vm7, %v1313_v46  ;;  %v1291_v55 = vmax.f32 %v2801_v20, %v1226_v11  ;;  %1391 = vrot.lane.b32.xlu0 %v2924_v47, %s1876_s16 }
 0x2a0   :  { %1340 = vst.msk [vmem:[#allocation5 + $0x28] sm:$0xf] %vm1336_vm8, %v1314_v25  ;;  %v1292_v2 = vmax.f32 %v2803_v44, %v1228_v19  ;;  %1393 = vrot.lane.b32.xlu1 %v2922_v21, %s1876_s16 }
 0x2a1   :  { %v1315_v38 = vmax.f32 %v1147_v36, %v1291_v55 }
 0x2a2   :  { %v1316_v33 = vmax.f32 %v1148_v3, %v1292_v2  ;;  %v1230_v37 = vpop.permute.xlu0 %1229 }
 0x2a3   :  { %v1232_v8 = vpop.permute.xlu1 %1231  ;;  %v2935_v34 = vld [vmem:[#allocation5 + $0x18] sm:$0xff]  ;;  %1341 = vst.msk [vmem:[#allocation5 + $0x30] sm:$0xff] %vm1333_vm7, %v1315_v38  ;;  %v1293_v6 = vmax.f32 %v2809_v50, %v1230_v37 }
 0x2a4   :  { %1342 = vst.msk [vmem:[#allocation5 + $0x38] sm:$0xff] %vm1333_vm7, %v1316_v33  ;;  %v1294_v22 = vmax.f32 %v2811_v17, %v1232_v8  ;;  %1395 = vrot.lane.b32.xlu0 %v2935_v34, %s1876_s16  ;;  %v3450_v33 = vld [vmem:[#allocation14_spill] sm:$0xff] }
 0x2a5   :  { %v1317_v52 = vmax.f32 %v1149_v4, %v1293_v6  ;;  %v3451_v4 = vld [vmem:[#allocation22_spill] sm:$0xff] }
 0x2a6   :  { %v1318_v13 = vmax.f32 %v1150_v18, %v1294_v22  ;;  %v1234_v59 = vpop.permute.xlu0 %1233  ;;  %v2947_v5 = vld [vmem:[#allocation5 + $0x20] sm:$0xff] }
 0x2a7   :  { %v1236_v0 = vpop.permute.xlu1 %1235  ;;  %1343 = vst.msk [vmem:[#allocation5 + $0x40] sm:$0xf] %vm1336_vm8, %v1317_v52  ;;  %v1295_v16 = vmax.f32 %v2817_v63, %v1234_v59  ;;  %1397 = vrot.lane.b32.xlu1 %v2947_v5, %s1876_s16  ;;  %v3452_v18 = vld [vmem:[#allocation20_spill] sm:$0xff]  ;;  %v3454_v52 = vld [vmem:[#allocation46_spill] sm:$0xff] }
 0x2a8   :  { %1344 = vst.msk [vmem:[#allocation5 + $0x48] sm:$0xff] %vm1333_vm7, %v1318_v13  ;;  %v1296_v50 = vmax.f32 %v2819_v14, %v1236_v0  ;;  %v1159_v22 = vmax.f32 %v3452_v18, %v3451_v4  ;;  %v3453_v13 = vld [vmem:[#allocation67_spill] sm:$0xff]  ;;  %v3455_v59 = vld [vmem:[#allocation48_spill] sm:$0xff] }
 0x2a9   :  { %v1319_v61 = vmax.f32 %v1151_v32, %v1295_v16  ;;  %v1160_v0 = vmax.f32 %v3454_v52, %v3453_v13  ;;  %v3456_v32 = vld [vmem:[#allocation66_spill] sm:$0xff]  ;;  %v3061_v52 = vld [vmem:[#allocation5 + $0x1c] sm:$0xff] }
 0x2aa   :  { %v1320_v30 = vmax.f32 %v1152_v29, %v1296_v50  ;;  %v1238_v27 = vpop.permute.xlu0 %1237  ;;  %v2963_v57 = vld [vmem:[#allocation5 + $0x30] sm:$0xff] }
 0x2ab   :  { %v1240_v53 = vpop.permute.xlu1 %1239  ;;  %v2961_v39 = vld [vmem:[#allocation5 + $0x38] sm:$0xff]  ;;  %1345 = vst.msk [vmem:[#allocation5 + $0x50] sm:$0xff] %vm1333_vm7, %v1319_v61  ;;  %v1297_v58 = vmax.f32 %v2825_v48, %v1238_v27  ;;  %1399 = vrot.lane.b32.xlu0 %v2963_v57, %s1876_s16  ;;  %v3457_v27 = vld [vmem:[#allocation68_spill] sm:$0xff] }
 0x2ac   :  { %1346 = vst.msk [vmem:[#allocation5 + $0x58] sm:$0xf] %vm1336_vm8, %v1320_v30  ;;  %v1298_v14 = vmax.f32 %v2827_v49, %v1240_v53  ;;  %1401 = vrot.lane.b32.xlu1 %v2961_v39, %s1876_s16 }
 0x2ad   :  { %v1321_v41 = vmax.f32 %v1153_v10, %v1297_v58  ;;  %v3459_v58 = vld [vmem:[#allocation50_spill] sm:$0xff] }
 0x2ae   :  { %v1322_v56 = vmax.f32 %v1154_v43, %v1298_v14  ;;  %v1242_v62 = vpop.permute.xlu0 %1241  ;;  %v3458_v43 = vld [vmem:[#allocation47_spill] sm:$0xff] }
 0x2af   :  { %v1244_v42 = vpop.permute.xlu1 %1243  ;;  %v2975_v25 = vld [vmem:[#allocation5 + $0x48] sm:$0xff]  ;;  %1347 = vst.msk [vmem:[#allocation5 + $0x60] sm:$0xff] %vm1333_vm7, %v1321_v41  ;;  %v1299_v36 = vmax.f32 %v2833_v31, %v1242_v62  ;;  %v1161_v14 = vmax.f32 %v3458_v43, %v3457_v27 }
 0x2b0   :  { %1348 = vst.msk [vmem:[#allocation5 + $0x68] sm:$0xff] %vm1333_vm7, %v1322_v56  ;;  %v1300_v46 = vmax.f32 %v2835_v23, %v1244_v42  ;;  %1403 = vrot.lane.b32.xlu0 %v2975_v25, %s1876_s16  ;;  %v3449_v31 = vld [vmem:[#allocation65_spill] sm:$0xff]  ;;  %v3460_v56 = vld [vmem:[#allocation28_spill] sm:$0xff]  ;;  %v3461_v42 = vld [vmem:[#allocation31_spill] sm:$0xff] }
 0x2b1   :  { %v1323_v11 = vmax.f32 %v1155_v28, %v1299_v36  ;;  %v1162_v41 = vmax.f32 %v3460_v56, %v3459_v58  ;;  %v3462_v28 = vld [vmem:[#allocation49_spill] sm:$0xff] }
 0x2b2   :  { %v1324_v19 = vmax.f32 %v1156_v26, %v1300_v46  ;;  %v1246_v2 = vpop.permute.xlu0 %1245  ;;  %v2987_v55 = vld [vmem:[#allocation5 + $0x50] sm:$0xff] }
 0x2b3   :  { %v1248_v3 = vpop.permute.xlu1 %1247  ;;  %1349 = vst.msk [vmem:[#allocation5 + $0x70] sm:$0xf] %vm1336_vm8, %v1323_v11  ;;  %v1301_v38 = vmax.f32 %v3450_v33, %v1246_v2  ;;  %1405 = vrot.lane.b32.xlu1 %v2987_v55, %s1876_s16  ;;  %v3463_v2 = vld [vmem:[#allocation51_spill] sm:$0xff] }
 0x2b4   :  { %1350 = vst.msk [vmem:[#allocation5 + $0x78] sm:$0xff] %vm1333_vm7, %v1324_v19  ;;  %v1302_v15 = vmax.f32 %v3449_v31, %v1248_v3 }
 0x2b5   :  { %v1325_v37 = vmax.f32 %v1157_v54, %v1301_v38  ;;  %v3465_v54 = vld [vmem:[#allocation12_spill] sm:$0xff] }
 0x2b6   :  { %v1326_v8 = vmax.f32 %v1158_v60, %v1302_v15  ;;  %v1250_v35 = vpop.permute.xlu0 %1249  ;;  %v3003_v40 = vld [vmem:[#allocation5 + $0x60] sm:$0xff]  ;;  %v3464_v60 = vld [vmem:[#allocation30_spill] sm:$0xff]  ;;  %v1163_v31 = vmax.f32 %v3465_v54, %v2903_v51  ;;  %v3466_v15 = vld [vmem:[#allocation37_spill] sm:$0xff] }
 0x2b7   :  { %v1252_v9 = vpop.permute.xlu1 %1251  ;;  %v3001_v6 = vld [vmem:[#allocation5 + $0x68] sm:$0xff]  ;;  %1351 = vst.msk [vmem:[#allocation5 + $0x80] sm:$0xff] %vm1333_vm7, %v1325_v37  ;;  %v1303_v50 = vmax.f32 %v3456_v32, %v1250_v35  ;;  %1407 = vrot.lane.b32.xlu0 %v3003_v40, %s1876_s16  ;;  %v1164_v12 = vmax.f32 %v3464_v60, %v3463_v2 }
 0x2b8   :  { %1352 = vst.msk [vmem:[#allocation5 + $0x88] sm:$0xf] %vm1336_vm8, %v1326_v8  ;;  %v1304_v29 = vmax.f32 %v3455_v59, %v1252_v9  ;;  %1409 = vrot.lane.b32.xlu1 %v3001_v6, %s1876_s16  ;;  %v3467_v8 = vld [vmem:[#allocation15_spill] sm:$0xff]  ;;  %v3053_v35 = vld [vmem:[#allocation5 + $0x4] sm:$0xff] }
 0x2b9   :  { %v1327_v30 = vmax.f32 %v1159_v22, %v1303_v50  ;;  %v3071_v50 = vld [vmem:[#allocation5 + $0x24] sm:$0xff] }
 0x2ba   :  { %v1328_v16 = vmax.f32 %v1160_v0, %v1304_v29  ;;  %v1254_v10 = vpop.permute.xlu0 %1253  ;;  %v3063_v0 = vld [vmem:[#allocation5 + $0xc] sm:$0xff]  ;;  %v3069_v29 = vld [vmem:[#allocation5 + $0x34] sm:$0xff] }
 0x2bb   :  { %v1256_v61 = vpop.permute.xlu1 %1255  ;;  %v3015_v53 = vld [vmem:[#allocation5 + $0x78] sm:$0xff]  ;;  %1353 = vst.msk [vmem:[#allocation5 + $0x90] sm:$0xff] %vm1333_vm7, %v1327_v30  ;;  %v1305_v26 = vmax.f32 %v3462_v28, %v1254_v10  ;;  %v3095_v43 = vld [vmem:[#allocation5 + $0x6c] sm:$0xff] }
 0x2bc   :  { %1354 = vst.msk [vmem:[#allocation5 + $0x98] sm:$0xff] %vm1333_vm7, %v1328_v16  ;;  %v1306_v62 = vmax.f32 %v3461_v42, %v1256_v61  ;;  %1411 = vrot.lane.b32.xlu0 %v3015_v53, %s1876_s16  ;;  %v3077_v16 = vld [vmem:[#allocation5 + $0x4c] sm:$0xff]  ;;  %v3079_v30 = vld [vmem:[#allocation5 + $0x3c] sm:$0xff]  ;;  %v3085_v61 = vld [vmem:[#allocation5 + $0x64] sm:$0xff] }
 0x2bd   :  { %v1329_v36 = vmax.f32 %v1161_v14, %v1305_v26  ;;  %v3087_v10 = vld [vmem:[#allocation5 + $0x54] sm:$0xff] }
 0x2be   :  { %v1330_v46 = vmax.f32 %v1162_v41, %v1306_v62  ;;  %v1258_v11 = vpop.permute.xlu0 %1257  ;;  %v3027_v3 = vld [vmem:[#allocation5 + $0x80] sm:$0xff] }
 0x2bf   :  { %v1260_v19 = vpop.permute.xlu1 %1259  ;;  %1355 = vst.msk [vmem:[#allocation5 + $0xa0] sm:$0xf] %vm1336_vm8, %v1329_v36  ;;  %v1307_v37 = vmax.f32 %v3467_v8, %v1258_v11  ;;  %1413 = vrot.lane.b32.xlu1 %v3027_v3, %s1876_s16  ;;  %v3093_v27 = vld [vmem:[#allocation5 + $0x7c] sm:$0xff]  ;;  %v3103_v58 = vld [vmem:[#allocation5 + $0x84] sm:$0xff] }
 0x2c0   :  { %1356 = vst.msk [vmem:[#allocation5 + $0xa8] sm:$0xff] %vm1333_vm7, %v1330_v46  ;;  %v1308_v38 = vmax.f32 %v3466_v15, %v1260_v19  ;;  %v1594_v46 = vld [vmem:[#allocation5 + $0x82] sm:$0xff] }
 0x2c1   :  { %v1331_v18 = vmax.f32 %v1163_v31, %v1307_v37 }
 0x2c2   :  { %v1332_v4 = vmax.f32 %v1164_v12, %v1308_v38  ;;  %v3041_v9 = vld [vmem:[#allocation5 + $0x90] sm:$0xff] }
 0x2c3   :  { %v3039_v22 = vld [vmem:[#allocation5 + $0x98] sm:$0xff]  ;;  %1357 = vst.msk [vmem:[#allocation5 + $0xb0] sm:$0xff] %vm1333_vm7, %v1331_v18  ;;  %1415 = vrot.lane.b32.xlu0 %v3041_v9, %s1876_s16 }
 0x2c4   :  { %1358 = vst.msk [vmem:[#allocation5 + $0xb8] sm:$0xf] %vm1336_vm8, %v1332_v4  ;;  %1417 = vrot.lane.b32.xlu1 %v3039_v22, %s1876_s16  ;;  %v3101_v14 = vld [vmem:[#allocation5 + $0x94] sm:$0xff] }
 0x2c5   :  { %v1595_v26 = vld [vmem:[#allocation5 + $0x92] sm:$0xff] }
 0x2c6   :  { %v3111_v41 = vld [vmem:[#allocation5 + $0x9c] sm:$0xff] }
 0x2c7   :  { %v3049_v51 = vld [vmem:[#allocation5 + $0xa8] sm:$0xff]  ;;  %v1596_v11 = vld [vmem:[#allocation5 + $0x9a] sm:$0xff] }
 0x2c8   :  { %1419 = vrot.lane.b32.xlu0 %v3049_v51, %s1876_s16 }
 0x2ca   :  { %v3055_v13 = vld [vmem:[#allocation5 + $0xb0] sm:$0xff] }
 0x2cb   :  { %1421 = vrot.lane.b32.xlu1 %v3055_v13, %s1876_s16  ;;  %v3109_v56 = vld [vmem:[#allocation5 + $0xac] sm:$0xff]  ;;  %v3117_v62 = vld [vmem:[#allocation5 + $0xb4] sm:$0xff] }
 0x2cc   :  { %1487 = vrot.lane.b32.xlu0 %v3053_v35, %s1876_s16  ;;  %v1597_v19 = vld [vmem:[#allocation5 + $0xaa] sm:$0xff]  ;;  %v1598_v12 = vld [vmem:[#allocation5 + $0xb2] sm:$0xff] }
 0x2cf   :  { %1489 = vrot.lane.b32.xlu1 %v3063_v0, %s1876_s16 }
 0x2d0   :  { %1491 = vrot.lane.b32.xlu0 %v3061_v52, %s1876_s16 }
 0x2d3   :  { %1493 = vrot.lane.b32.xlu1 %v3071_v50, %s1876_s16 }
 0x2d4   :  { %1495 = vrot.lane.b32.xlu0 %v3069_v29, %s1876_s16 }
 0x2d7   :  { %1497 = vrot.lane.b32.xlu1 %v3079_v30, %s1876_s16 }
 0x2d8   :  { %1499 = vrot.lane.b32.xlu0 %v3077_v16, %s1876_s16 }
 0x2db   :  { %1501 = vrot.lane.b32.xlu1 %v3087_v10, %s1876_s16 }
 0x2dc   :  { %1503 = vrot.lane.b32.xlu0 %v3085_v61, %s1876_s16 }
 0x2df   :  { %1505 = vrot.lane.b32.xlu1 %v3095_v43, %s1876_s16 }
 0x2e0   :  { %1507 = vrot.lane.b32.xlu0 %v3093_v27, %s1876_s16 }
 0x2e3   :  { %1509 = vrot.lane.b32.xlu1 %v3103_v58, %s1876_s16 }
 0x2e4   :  { %1511 = vrot.lane.b32.xlu0 %v3101_v14, %s1876_s16 }
 0x2e7   :  { %1513 = vrot.lane.b32.xlu1 %v3111_v41, %s1876_s16 }
 0x2e8   :  { %1515 = vrot.lane.b32.xlu0 %v3109_v56, %s1876_s16 }
 0x2eb   :  { %1517 = vrot.lane.b32.xlu1 %v3117_v62, %s1876_s16 }
 0x2ec   :  { %1632 = vrot.lane.b32.xlu0 %v2777_v24, %s1876_s16  ;;  %v1583_v24 = vld [vmem:[#allocation5 + $0x2] sm:$0xff] }
 0x2ef   :  { %1634 = vrot.lane.b32.xlu1 %v2779_v1, %s1876_s16  ;;  %v1585_v1 = vld [vmem:[#allocation5 + $0x1a] sm:$0xff] }
 0x2f0   :  { %1636 = vrot.lane.b32.xlu0 %v2787_v45, %s1876_s16  ;;  %v1584_v45 = vld [vmem:[#allocation5 + $0xa] sm:$0xff] }
 0x2f3   :  { %1638 = vrot.lane.b32.xlu1 %v2793_v7, %s1876_s16  ;;  %v1587_v7 = vld [vmem:[#allocation5 + $0x32] sm:$0xff] }
 0x2f4   :  { %1640 = vrot.lane.b32.xlu0 %v2801_v20, %s1876_s16  ;;  %v1586_v20 = vld [vmem:[#allocation5 + $0x22] sm:$0xff] }
 0x2f7   :  { %1642 = vrot.lane.b32.xlu1 %v2803_v44, %s1876_s16  ;;  %v1589_v44 = vld [vmem:[#allocation5 + $0x4a] sm:$0xff] }
 0x2f8   :  { %1644 = vrot.lane.b32.xlu0 %v2811_v17, %s1876_s16  ;;  %v1588_v17 = vld [vmem:[#allocation5 + $0x3a] sm:$0xff] }
 0x2fb   :  { %1646 = vrot.lane.b32.xlu1 %v2817_v63, %s1876_s16 }
 0x2fc   :  { %1648 = vrot.lane.b32.xlu0 %v2825_v48, %s1876_s16  ;;  %v1591_v48 = vld [vmem:[#allocation5 + $0x62] sm:$0xff] }
 0x2ff   :  { %1650 = vrot.lane.b32.xlu1 %v2827_v49, %s1876_s16  ;;  %v1590_v49 = vld [vmem:[#allocation5 + $0x52] sm:$0xff] }
 0x300   :  { %1652 = vrot.lane.b32.xlu0 %v2835_v23, %s1876_s16 }
 0x303   :  { %1654 = vrot.lane.b32.xlu1 %v3450_v33, %s1876_s16 }
 0x304   :  { %1656 = vrot.lane.b32.xlu0 %v3456_v32, %s1876_s16  ;;  %v1592_v32 = vld [vmem:[#allocation5 + $0x6a] sm:$0xff] }
 0x307   :  { %1658 = vrot.lane.b32.xlu1 %v3455_v59, %s1876_s16  ;;  %v1593_v59 = vld [vmem:[#allocation5 + $0x7a] sm:$0xff] }
 0x308   :  { %1660 = vrot.lane.b32.xlu0 %v3461_v42, %s1876_s16 }
 0x30b   :  { %1662 = vrot.lane.b32.xlu1 %v3467_v8, %s1876_s16 }
 0x30c   :  { %1713 = vrot.lane.b32.xlu0 %v1583_v24, %s1874_s14 }
 0x30f   :  { %1715 = vrot.lane.b32.xlu1 %v1584_v45, %s1874_s14 }
 0x310   :  { %1717 = vrot.lane.b32.xlu0 %v1585_v1, %s1874_s14 }
 0x311   :  { %v1392_v63 = vpop.permute.xlu0 %1391 }
 0x312   :  { %v1394_v23 = vpop.permute.xlu1 %1393  ;;  %v1439_v1 = vmax.f32 %v2924_v47, %v1392_v63 }
 0x313   :  { %1719 = vrot.lane.b32.xlu1 %v1586_v20, %s1874_s14 }
 0x314   :  { %1721 = vrot.lane.b32.xlu0 %v1587_v7, %s1874_s14 }
 0x316   :  { %v1396_v33 = vpop.permute.xlu0 %1395 }
 0x317   :  { %1723 = vrot.lane.b32.xlu1 %v1588_v17, %s1874_s14  ;;  %v1440_v17 = vmax.f32 %v2922_v21, %v1394_v23 }
 0x318   :  { %1725 = vrot.lane.b32.xlu0 %v1589_v44, %s1874_s14 }
 0x319   :  { %v1398_v42 = vpop.permute.xlu1 %1397 }
 0x31a   :  { %v1442_v47 = vmax.f32 %v2947_v5, %v1398_v42 }
 0x31b   :  { %1727 = vrot.lane.b32.xlu1 %v1590_v49, %s1874_s14 }
 0x31c   :  { %1729 = vrot.lane.b32.xlu0 %v1591_v48, %s1874_s14  ;;  %v1441_v48 = vmax.f32 %v2935_v34, %v1396_v33 }
 0x31d   :  { %v1400_v28 = vpop.permute.xlu0 %1399 }
 0x31e   :  { %v1402_v36 = vpop.permute.xlu1 %1401 }
 0x31f   :  { %1731 = vrot.lane.b32.xlu1 %v1592_v32, %s1874_s14  ;;  %v1444_v33 = vmax.f32 %v2961_v39, %v1402_v36 }
 0x320   :  { %1733 = vrot.lane.b32.xlu0 %v1593_v59, %s1874_s14 }
 0x322   :  { %v1404_v2 = vpop.permute.xlu0 %1403 }
 0x323   :  { %1735 = vrot.lane.b32.xlu1 %v1594_v46, %s1874_s14 }
 0x324   :  { %1737 = vrot.lane.b32.xlu0 %v1595_v26, %s1874_s14 }
 0x325   :  { %v1406_v60 = vpop.permute.xlu1 %1405 }
 0x327   :  { %1739 = vrot.lane.b32.xlu1 %v1596_v11, %s1874_s14  ;;  %v1445_v11 = vmax.f32 %v2975_v25, %v1404_v2 }
 0x328   :  { %1741 = vrot.lane.b32.xlu0 %v1597_v19, %s1874_s14 }
 0x329   :  { %v1408_v54 = vpop.permute.xlu0 %1407 }
 0x32a   :  { %v1410_v31 = vpop.permute.xlu1 %1409 }
 0x32b   :  { %1743 = vrot.lane.b32.xlu1 %v1598_v12, %s1874_s14  ;;  %v1446_v12 = vmax.f32 %v2987_v55, %v1406_v60 }
 0x32e   :  { %v1412_v15 = vpop.permute.xlu0 %1411 }
 0x331   :  { %v3169_v38 = vpop.permute.xlu1 %1413 }
 0x335   :  { %v3171_v8 = vpop.permute.xlu0 %1415 }
 0x336   :  { %v3173_v37 = vpop.permute.xlu1 %1417 }
 0x33a   :  { %v3175_v4 = vpop.permute.xlu0 %1419 }
 0x33d   :  { %v3177_v18 = vpop.permute.xlu1 %1421 }
 0x33e   :  { %v1488_v24 = vpop.permute.xlu0 %1487 }
 0x33f   :  { %v1535_v45 = vmax.f32 %v3053_v35, %v1488_v24  ;;  %v1443_v35 = vmax.f32 %v2963_v57, %v1400_v28  ;;  %v1447_v24 = vmax.f32 %v3003_v40, %v1408_v54 }
 0x341   :  { %v1551_v7 = vmax.f32 %v1439_v1, %v1535_v45  ;;  %v1490_v20 = vpop.permute.xlu1 %1489  ;;  %v1448_v1 = vmax.f32 %v3001_v6, %v1410_v31  ;;  %v1449_v45 = vmax.f32 %v3015_v53, %v1412_v15  ;;  %v1451_v6 = vmax.f32 %v3041_v9, %v3171_v8 }
 0x342   :  { %v1492_v44 = vpop.permute.xlu0 %1491  ;;  %v1536_v49 = vmax.f32 %v3063_v0, %v1490_v20 }
 0x343   :  { %1779 = vst.msk [vmem:[#allocation9 + $0xc0] sm:$0xff] %vm1599_vm3, %v1551_v7  ;;  %v1537_v59 = vmax.f32 %v3061_v52, %v1492_v44  ;;  %v1450_v7 = vmax.f32 %v3027_v3, %v3169_v38  ;;  %v1452_v44 = vmax.f32 %v3039_v22, %v3173_v37  ;;  %v1453_v3 = vmax.f32 %v3049_v51, %v3175_v4 }
 0x344   :  { %v1552_v32 = vmax.f32 %v1440_v17, %v1536_v49 }
 0x345   :  { %v1553_v26 = vmax.f32 %v1441_v48, %v1537_v59  ;;  %v1494_v46 = vpop.permute.xlu1 %1493  ;;  %v1454_v48 = vmax.f32 %v3055_v13, %v3177_v18 }
 0x346   :  { %v1496_v19 = vpop.permute.xlu0 %1495  ;;  %1780 = vst.msk [vmem:[#allocation9 + $0xc8] sm:$0xff] %vm1599_vm3, %v1552_v32  ;;  %v1538_v21 = vmax.f32 %v3071_v50, %v1494_v46 }
 0x347   :  { %1781 = vst.msk [vmem:[#allocation9 + $0xd0] sm:$0xff] %vm1599_vm3, %v1553_v26  ;;  %v1539_v34 = vmax.f32 %v3069_v29, %v1496_v19 }
 0x348   :  { %v1554_v63 = vmax.f32 %v1442_v47, %v1538_v21 }
 0x349   :  { %v1555_v0 = vmax.f32 %v1443_v35, %v1539_v34  ;;  %v1498_v23 = vpop.permute.xlu1 %1497 }
 0x34a   :  { %v1500_v52 = vpop.permute.xlu0 %1499  ;;  %1782 = vst.msk [vmem:[#allocation9 + $0xd8] sm:$0xff] %vm1599_vm3, %v1554_v63  ;;  %v1540_v5 = vmax.f32 %v3079_v30, %v1498_v23 }
 0x34b   :  { %1783 = vst.msk [vmem:[#allocation9 + $0xe0] sm:$0xff] %vm1599_vm3, %v1555_v0  ;;  %v1541_v57 = vmax.f32 %v3077_v16, %v1500_v52 }
 0x34c   :  { %v1556_v42 = vmax.f32 %v1444_v33, %v1540_v5 }
 0x34d   :  { %v1557_v50 = vmax.f32 %v1445_v11, %v1541_v57  ;;  %v1502_v28 = vpop.permute.xlu1 %1501 }
 0x34e   :  { %v1504_v29 = vpop.permute.xlu0 %1503  ;;  %1784 = vst.msk [vmem:[#allocation9 + $0xe8] sm:$0xff] %vm1599_vm3, %v1556_v42  ;;  %v1542_v39 = vmax.f32 %v3087_v10, %v1502_v28 }
 0x34f   :  { %1785 = vst.msk [vmem:[#allocation9 + $0xf0] sm:$0xff] %vm1599_vm3, %v1557_v50  ;;  %v1543_v25 = vmax.f32 %v3085_v61, %v1504_v29 }
 0x350   :  { %v1558_v36 = vmax.f32 %v1446_v12, %v1542_v39 }
 0x351   :  { %v1559_v30 = vmax.f32 %v1447_v24, %v1543_v25  ;;  %v1506_v2 = vpop.permute.xlu1 %1505 }
 0x352   :  { %v1508_v16 = vpop.permute.xlu0 %1507  ;;  %1786 = vst.msk [vmem:[#allocation9 + $0xf8] sm:$0xff] %vm1599_vm3, %v1558_v36  ;;  %v1544_v55 = vmax.f32 %v3095_v43, %v1506_v2 }
 0x353   :  { %1787 = vst.msk [vmem:[#allocation9 + $0x1c0] sm:$0xff] %vm1599_vm3, %v1559_v30  ;;  %v1545_v40 = vmax.f32 %v3093_v27, %v1508_v16 }
 0x354   :  { %v1560_v60 = vmax.f32 %v1448_v1, %v1544_v55 }
 0x355   :  { %v1561_v10 = vmax.f32 %v1449_v45, %v1545_v40  ;;  %v1510_v54 = vpop.permute.xlu1 %1509 }
 0x356   :  { %v1512_v61 = vpop.permute.xlu0 %1511  ;;  %1788 = vst.msk [vmem:[#allocation9 + $0x1c8] sm:$0xff] %vm1599_vm3, %v1560_v60  ;;  %v1546_v53 = vmax.f32 %v3103_v58, %v1510_v54 }
 0x357   :  { %1789 = vst.msk [vmem:[#allocation9 + $0x1d0] sm:$0xff] %vm1599_vm3, %v1561_v10  ;;  %v1547_v43 = vmax.f32 %v3101_v14, %v1512_v61 }
 0x358   :  { %v1562_v31 = vmax.f32 %v1450_v7, %v1546_v53 }
 0x359   :  { %v1563_v27 = vmax.f32 %v1451_v6, %v1547_v43  ;;  %v1514_v15 = vpop.permute.xlu1 %1513 }
 0x35a   :  { %v1516_v20 = vpop.permute.xlu0 %1515  ;;  %1790 = vst.msk [vmem:[#allocation9 + $0x1d8] sm:$0xff] %vm1599_vm3, %v1562_v31  ;;  %v1548_v9 = vmax.f32 %v3111_v41, %v1514_v15 }
 0x35b   :  { %1791 = vst.msk [vmem:[#allocation9 + $0x1e0] sm:$0xff] %vm1599_vm3, %v1563_v27  ;;  %v1549_v58 = vmax.f32 %v3109_v56, %v1516_v20 }
 0x35c   :  { %v1564_v38 = vmax.f32 %v1452_v44, %v1548_v9 }
 0x35d   :  { %v1565_v14 = vmax.f32 %v1453_v3, %v1549_v58  ;;  %v1518_v8 = vpop.permute.xlu1 %1517 }
 0x35e   :  { %v1633_v17 = vpop.permute.xlu0 %1632  ;;  %1792 = vst.msk [vmem:[#allocation9 + $0x1e8] sm:$0xff] %vm1599_vm3, %v1564_v38  ;;  %v1550_v22 = vmax.f32 %v3117_v62, %v1518_v8 }
 0x35f   :  { %1793 = vst.msk [vmem:[#allocation9 + $0x1f0] sm:$0xff] %vm1599_vm3, %v1565_v14  ;;  %1681 = vst.msk [vmem:[#allocation9 + $0x40] sm:$0xff] %vm1599_vm3, %v1633_v17 }
 0x360   :  { %v1566_v51 = vmax.f32 %v1454_v48, %v1550_v22 }
 0x361   :  { %v1635_v37 = vpop.permute.xlu1 %1634 }
 0x362   :  { %v1637_v41 = vpop.permute.xlu0 %1636  ;;  %1794 = vst.msk [vmem:[#allocation9 + $0x1f8] sm:$0xff] %vm1599_vm3, %v1566_v51  ;;  %1682 = vst.msk [vmem:[#allocation9 + $0x48] sm:$0xff] %vm1599_vm3, %v1635_v37 }
 0x363   :  { %1683 = vst.msk [vmem:[#allocation9 + $0x50] sm:$0xff] %vm1599_vm3, %v1637_v41 }
 0x365   :  { %v1639_v56 = vpop.permute.xlu1 %1638 }
 0x366   :  { %v1641_v4 = vpop.permute.xlu0 %1640  ;;  %1684 = vst.msk [vmem:[#allocation9 + $0x58] sm:$0xff] %vm1599_vm3, %v1639_v56 }
 0x367   :  { %1685 = vst.msk [vmem:[#allocation9 + $0x60] sm:$0xff] %vm1599_vm3, %v1641_v4 }
 0x369   :  { %v1643_v13 = vpop.permute.xlu1 %1642 }
 0x36a   :  { %v1645_v18 = vpop.permute.xlu0 %1644  ;;  %1686 = vst.msk [vmem:[#allocation9 + $0x68] sm:$0xff] %vm1599_vm3, %v1643_v13 }
 0x36b   :  { %1687 = vst.msk [vmem:[#allocation9 + $0x70] sm:$0xff] %vm1599_vm3, %v1645_v18 }
 0x36d   :  { %v1647_v62 = vpop.permute.xlu1 %1646 }
 0x36e   :  { %v1649_v49 = vpop.permute.xlu0 %1648  ;;  %1688 = vst.msk [vmem:[#allocation9 + $0x78] sm:$0xff] %vm1599_vm3, %v1647_v62 }
 0x36f   :  { %1689 = vst.msk [vmem:[#allocation9 + $0x140] sm:$0xff] %vm1599_vm3, %v1649_v49 }
 0x371   :  { %v1651_v59 = vpop.permute.xlu1 %1650 }
 0x372   :  { %v1653_v32 = vpop.permute.xlu0 %1652  ;;  %1690 = vst.msk [vmem:[#allocation9 + $0x148] sm:$0xff] %vm1599_vm3, %v1651_v59 }
 0x373   :  { %1691 = vst.msk [vmem:[#allocation9 + $0x150] sm:$0xff] %vm1599_vm3, %v1653_v32 }
 0x375   :  { %v1655_v26 = vpop.permute.xlu1 %1654 }
 0x376   :  { %v1657_v46 = vpop.permute.xlu0 %1656  ;;  %1692 = vst.msk [vmem:[#allocation9 + $0x158] sm:$0xff] %vm1599_vm3, %v1655_v26 }
 0x377   :  { %1693 = vst.msk [vmem:[#allocation9 + $0x160] sm:$0xff] %vm1599_vm3, %v1657_v46 }
 0x379   :  { %v1659_v19 = vpop.permute.xlu1 %1658 }
 0x37a   :  { %v1661_v47 = vpop.permute.xlu0 %1660  ;;  %1694 = vst.msk [vmem:[#allocation9 + $0x168] sm:$0xff] %vm1599_vm3, %v1659_v19 }
 0x37b   :  { %1695 = vst.msk [vmem:[#allocation9 + $0x170] sm:$0xff] %vm1599_vm3, %v1661_v47 }
 0x37d   :  { %v1663_v35 = vpop.permute.xlu1 %1662 }
 0x37e   :  { %v1714_v21 = vpop.permute.xlu0 %1713  ;;  %1696 = vst.msk [vmem:[#allocation9 + $0x178] sm:$0xff] %vm1599_vm3, %v1663_v35 }
 0x37f   :  { %1762 = vst.msk [vmem:[#allocation9 + $0x80] sm:$0xff] %vm1599_vm3, %v1714_v21 }
 0x381   :  { %v1716_v34 = vpop.permute.xlu1 %1715 }
 0x382   :  { %v1718_v63 = vpop.permute.xlu0 %1717  ;;  %1763 = vst.msk [vmem:[#allocation9 + $0x88] sm:$0xff] %vm1599_vm3, %v1716_v34 }
 0x383   :  { %1764 = vst.msk [vmem:[#allocation9 + $0x90] sm:$0xff] %vm1599_vm3, %v1718_v63 }
 0x385   :  { %v1720_v0 = vpop.permute.xlu1 %1719 }
 0x386   :  { %v1722_v23 = vpop.permute.xlu0 %1721  ;;  %1765 = vst.msk [vmem:[#allocation9 + $0x98] sm:$0xff] %vm1599_vm3, %v1720_v0 }
 0x387   :  { %1766 = vst.msk [vmem:[#allocation9 + $0xa0] sm:$0xff] %vm1599_vm3, %v1722_v23 }
 0x389   :  { %v1724_v52 = vpop.permute.xlu1 %1723 }
 0x38a   :  { %v1726_v33 = vpop.permute.xlu0 %1725  ;;  %1767 = vst.msk [vmem:[#allocation9 + $0xa8] sm:$0xff] %vm1599_vm3, %v1724_v52 }
 0x38b   :  { %1768 = vst.msk [vmem:[#allocation9 + $0xb0] sm:$0xff] %vm1599_vm3, %v1726_v33 }
 0x38d   :  { %v1728_v11 = vpop.permute.xlu1 %1727 }
 0x38e   :  { %v1730_v5 = vpop.permute.xlu0 %1729  ;;  %1769 = vst.msk [vmem:[#allocation9 + $0xb8] sm:$0xff] %vm1599_vm3, %v1728_v11 }
 0x38f   :  { %1770 = vst.msk [vmem:[#allocation9 + $0x180] sm:$0xff] %vm1599_vm3, %v1730_v5 }
 0x391   :  { %v1732_v57 = vpop.permute.xlu1 %1731 }
 0x392   :  { %v1734_v42 = vpop.permute.xlu0 %1733  ;;  %1771 = vst.msk [vmem:[#allocation9 + $0x188] sm:$0xff] %vm1599_vm3, %v1732_v57 }
 0x393   :  { %1772 = vst.msk [vmem:[#allocation9 + $0x190] sm:$0xff] %vm1599_vm3, %v1734_v42 }
 0x395   :  { %v1736_v50 = vpop.permute.xlu1 %1735 }
 0x396   :  { %v1738_v28 = vpop.permute.xlu0 %1737  ;;  %1773 = vst.msk [vmem:[#allocation9 + $0x198] sm:$0xff] %vm1599_vm3, %v1736_v50 }
 0x397   :  { %1774 = vst.msk [vmem:[#allocation9 + $0x1a0] sm:$0xff] %vm1599_vm3, %v1738_v28 }
 0x399   :  { %v1740_v29 = vpop.permute.xlu1 %1739 }
 0x39a   :  { %v1742_v12 = vpop.permute.xlu0 %1741  ;;  %1775 = vst.msk [vmem:[#allocation9 + $0x1a8] sm:$0xff] %vm1599_vm3, %v1740_v29 }
 0x39b   :  { %1776 = vst.msk [vmem:[#allocation9 + $0x1b0] sm:$0xff] %vm1599_vm3, %v1742_v12 }
 0x39d   :  { %v1744_v24 = vpop.permute.xlu1 %1743 }
 0x39e   :  { %1777 = vst.msk [vmem:[#allocation9 + $0x1b8] sm:$0xff] %vm1599_vm3, %v1744_v24 }
 0x39f   :  { %1855 = shalt.err (!%p1852_p9)
}
 0x3a0   :  { %1806 = dma.vmem_to_hbm [thread:$0]  %s1801_s18, 8192, %s3271_s1, [#allocation8], %s1869_s9, %s1869_s9, %s1870_s10  }
 0x3a1   :  { %1866 = dma.done.wait [#allocation8], 8192  }
 0x3a2   :  { %1867 = vsyncadd [#allocation8], 4294959104 }
 0x3a3   :  { %1810 = vsyncpa [#allocation7], 1 }
 0x3a4   :  { %1811 = vsyncpa [#allocation8], 1 }

</bundles_post_ra>
